<compile_context>
chip_gen: v7x
topology: tpu7x:2x2x1
jax: 0.10.0
libtpu: 0.0.40
codegen_flags: <defaults>
</compile_context>

<pallas_src>
import functools

import jax
import jax.numpy as jnp
from jax import lax
from jax.experimental import pallas as pl
from jax.experimental.pallas import tpu as pltpu


def _assign_attention_kernel(*refs, num_heads, scale, hard, sum_assign,
                             assign_eps, separate_value):
    if separate_value:
        q_in, k_in, v_in, wq_ref, wkv_ref, wo_ref, bo_ref, o_ref = refs
    else:
        q_in, k_in, wq_ref, wkv_ref, wo_ref, bo_ref, o_ref = refs
        v_in = k_in

    bf16, f32 = jnp.bfloat16, jnp.float32
    Bt, N, C = q_in.shape
    S = k_in.shape[1]
    H = num_heads
    d = C // H

    # ---- q projection: one (Bt*N, C) matmul; scale folded into q -----------
    xq = q_in[...].reshape(Bt * N, C)
    q = jnp.dot(xq.astype(bf16), wq_ref[...], preferred_element_type=f32)
    q_bf = (q * jnp.float32(scale)).astype(bf16)                 # (Bt*N, C)

    # ---- fused k/v projection: single (Bt*S, C) @ (C, 2C) matmul -----------
    if separate_value:
        xk = k_in[...].reshape(Bt * S, C)
        xv = v_in[...].reshape(Bt * S, C)
        k_bf = jnp.dot(xk.astype(bf16), wkv_ref[:, :C],
                       preferred_element_type=f32).astype(bf16)  # (Bt*S, C)
        v_bf = jnp.dot(xv.astype(bf16), wkv_ref[:, C:],
                       preferred_element_type=f32).astype(bf16)  # (Bt*S, C)
    else:
        xkv = k_in[...].reshape(Bt * S, C)
        kv = jnp.dot(xkv.astype(bf16), wkv_ref[...],
                     preferred_element_type=f32).astype(bf16)    # (Bt*S, 2C)
        k_bf = kv[:, :C]
        v_bf = kv[:, C:]

    # hoisted: identical for every (b, h); JAX does not CSE broadcast_in_dim
    n_iota = lax.broadcasted_iota(jnp.int32, (N, S), 0)

    # ---- per (batch, head) assign-attention; head outputs stay in registers -
    rows = []
    for b in range(Bt):
        heads = []
        for h in range(H):
            qs = q_bf[b * N:(b + 1) * N, h * d:(h + 1) * d]      # (N, d)
            ks = k_bf[b * S:(b + 1) * S, h * d:(h + 1) * d]      # (S, d)
            vs = v_bf[b * S:(b + 1) * S, h * d:(h + 1) * d]      # (S, d)

            # raw = q_h @ k_h^T (contract head dim directly, no explicit .T)
            raw = lax.dot_general(qs, ks, (((1,), (1,)), ((), ())),
                                  preferred_element_type=f32)    # (N, S)

            if hard:
                # hard_softmax over dim=-2 (the N/group axis); straight-through
                # forward value is the one-hot at the first argmax per column.
                col_max = jnp.max(raw, axis=0, keepdims=True)               # (1, S)
                first_n = jnp.min(jnp.where(raw == col_max, n_iota, N),
                                  axis=0, keepdims=True)                    # (1, S)
                attn = (n_iota == first_n).astype(f32)                      # (N, S)
            else:
                attn = jax.nn.softmax(raw, axis=0)

            if not sum_assign:
                denom = jnp.sum(attn, axis=1, keepdims=True) + jnp.float32(assign_eps)
                attn = attn * pl.reciprocal(denom, approx=True)   # EUP slot

            heads.append(jnp.dot(attn.astype(bf16), vs,
                                 preferred_element_type=f32).astype(bf16))  # (N, d)
        rows.append(jnp.concatenate(heads, axis=-1) if H > 1 else heads[0])

    ctx = jnp.concatenate(rows, axis=0) if Bt > 1 else rows[0]    # (Bt*N, C) bf16

    # ---- output projection (Linear with bias); dropouts are identity (p=0) --
    out = jnp.dot(ctx, wo_ref[...], preferred_element_type=f32) + bo_ref[0]
    o_ref[...] = out.reshape(Bt, N, C).astype(o_ref.dtype)


def _pick_batch_block(B, requested):
    bt = max(1, min(requested, B))
    while B % bt != 0:
        bt -= 1
    # keep >= 2 grid steps when possible so both v7x TensorCores get work
    while bt > 1 and B // bt < 2:
        bt = max(1, bt // 2)
        while B % bt != 0:
            bt -= 1
    return bt


def assign_attention(query, key=None, value=None, *, params, num_heads,
                     qk_scale=None, hard=True, gumbel=False,
                     sum_assign=False, assign_eps=1.0, batch_block=4):
    if gumbel:
        # TODO(synk): gumbel_softmax path (training-time stochastic sampling) not implemented.
        raise NotImplementedError("gumbel=True path is not implemented in the Pallas kernel")
    if key is None:
        key = query
    separate_value = (value is not None) and (value is not key)
    if value is None:
        value = key

    B, N, C = query.shape
    S = key.shape[1]
    assert C % num_heads == 0
    d = C // num_heads
    scale = qk_scale if qk_scale is not None else d ** -0.5

    Bt = _pick_batch_block(B, batch_block)
    grid = (B // Bt,)
    n_kv_streams = 2 if separate_value else 1

    # rough per-step working-set estimate; hard cap at 48 MiB (< v7x's 64 MiB
    # physical VMEM so the compiler keeps headroom for its own scratch).
    in_b = query.dtype.itemsize
    weight_bytes = 4 * C * C * 2 + C * 4                          # bf16 wq+wkv+wo, f32 bias
    block_bytes = 2 * in_b * Bt * (N * C + n_kv_streams * S * C) \
                + 2 * in_b * Bt * N * C                           # double-buffered blocks
    interm_bytes = 6 * Bt * (N * C + 2 * S * C) + 12 * N * S + 6 * Bt * N * C
    vmem_limit = min(48 * 1024 * 1024,
                     max(16 * 1024 * 1024,
                         2 * (2 * weight_bytes + block_bytes + interm_bytes)))

    proj_flops = 2 * C * C * (2 * N + 2 * S)                      # q, fused kv, out projections
    attn_flops = 4 * N * S * C                                    # q@k^T and attn@v (all heads)
    cost = pl.CostEstimate(
        flops=B * (proj_flops + attn_flops),
        transcendentals=0 if hard else B * num_heads * N * S,
        bytes_accessed=(in_b * B * N * C                          # query
                        + key.dtype.itemsize * B * S * C * n_kv_streams
                        + in_b * B * N * C                        # output
                        + weight_bytes),
    )

    kernel = functools.partial(
        _assign_attention_kernel,
        num_heads=num_heads, scale=float(scale), hard=hard,
        sum_assign=sum_assign, assign_eps=float(assign_eps),
        separate_value=separate_value,
    )

    # grid-invariant weights: constant index_map (never re-DMA'd across steps)
    const = lambda shape: pl.BlockSpec(shape, lambda i: (0,) * len(shape))

    in_specs = [
        pl.BlockSpec((Bt, N, C), lambda i: (i, 0, 0)),            # query block
        pl.BlockSpec((Bt, S, C), lambda i: (i, 0, 0)),            # key (== value when deduped)
    ]
    operands = [query, key]
    if separate_value:
        in_specs.append(pl.BlockSpec((Bt, S, C), lambda i: (i, 0, 0)))
        operands.append(value)
    in_specs += [const((C, C)),        # Wq   (bf16)
                 const((C, 2 * C)),    # Wkv  (bf16, fused)
                 const((C, C)),        # Wproj(bf16)
                 const((1, C))]        # bproj(f32)
    operands += [params["wq"], params["wkv"], params["wproj"], params["bproj"]]

    return pl.pallas_call(
        kernel,
        out_shape=jax.ShapeDtypeStruct((B, N, C), query.dtype),
        grid=grid,
        in_specs=in_specs,
        out_specs=pl.BlockSpec((Bt, N, C), lambda i: (i, 0, 0)),
        compiler_params=pltpu.CompilerParams(
            dimension_semantics=("parallel",),
            vmem_limit_bytes=int(vmem_limit),
        ),
        cost_estimate=cost,
    )(*operands)


def init_params(rng, dim):
    ks = jax.random.split(rng, 5)
    s = 0.02
    # weights stored pre-transposed (in, out) so the kernel does x @ W.
    # Wk / Wv are pre-fused into a single (dim, 2*dim) weight.
    wk = jax.random.normal(ks[1], (dim, dim), jnp.float32) * s
    wv = jax.random.normal(ks[2], (dim, dim), jnp.float32) * s
    return {
        "wq": (jax.random.normal(ks[0], (dim, dim), jnp.float32) * s).astype(jnp.bfloat16),
        "wkv": jnp.concatenate([wk, wv], axis=1).astype(jnp.bfloat16),
        "wproj": (jax.random.normal(ks[3], (dim, dim), jnp.float32) * s).astype(jnp.bfloat16),
        "bproj": jax.random.normal(ks[4], (1, dim), jnp.float32) * s,
    }


def reference_assign_attention(query, key, value, params, num_heads,
                               qk_scale=None, hard=True, sum_assign=False,
                               assign_eps=1.0):
    """Pure-JAX reference of the same forward pass (same bf16-operand policy)."""
    B, N, C = query.shape
    S = key.shape[1]
    H = num_heads
    d = C // H
    scale = qk_scale if qk_scale is not None else d ** -0.5
    bf, f32 = jnp.bfloat16, jnp.float32

    wk = params["wkv"][:, :C]
    wv = params["wkv"][:, C:]

    q = jnp.einsum("bnc,cd->bnd", query.astype(bf), params["wq"],
                   preferred_element_type=f32) * scale
    k = jnp.einsum("bsc,cd->bsd", key.astype(bf), wk, preferred_element_type=f32)
    v = jnp.einsum("bsc,cd->bsd", value.astype(bf), wv, preferred_element_type=f32)

    q = q.reshape(B, N, H, d).transpose(0, 2, 1, 3).astype(bf)
    k = k.reshape(B, S, H, d).transpose(0, 2, 1, 3).astype(bf)
    v = v.reshape(B, S, H, d).transpose(0, 2, 1, 3).astype(bf)

    raw = jnp.einsum("bhnd,bhsd->bhns", q, k, preferred_element_type=f32)

    if hard:
        col_max = jnp.max(raw, axis=-2, keepdims=True)
        n_iota = jnp.arange(N, dtype=jnp.int32)[None, None, :, None]
        first_n = jnp.min(jnp.where(raw == col_max, n_iota, N),
                          axis=-2, keepdims=True)
        attn = (n_iota == first_n).astype(f32)
    else:
        attn = jax.nn.softmax(raw, axis=-2)

    if not sum_assign:
        attn = attn / (jnp.sum(attn, axis=-1, keepdims=True) + assign_eps)

    out = jnp.einsum("bhns,bhsd->bhnd", attn.astype(bf), v,
                     preferred_element_type=f32)
    out = out.transpose(0, 2, 1, 3).reshape(B, N, C)
    out = jnp.einsum("bnc,cd->bnd", out.astype(bf), params["wproj"],
                     preferred_element_type=f32) + params["bproj"][0]
    return out


if __name__ == "__main__":
    # N query/group tokens assign S key/value tokens; C lane-dense (=128).
    # B=4 with batch_block default -> Bt=2 per grid step, grid=(2,).
    B, N, S, C = 4, 16, 128, 128
    num_heads = 4

    root = jax.random.PRNGKey(0)
    kq, kk, kp = jax.random.split(root, 3)
    query = jax.random.normal(kq, (B, N, C), jnp.float32)
    tokens = jax.random.normal(kk, (B, S, C), jnp.float32)   # key == value (module default)
    params = init_params(kp, C)

    out = assign_attention(query, tokens, params=params, num_heads=num_heads)
    out = jax.block_until_ready(out)

    ref = reference_assign_attention(query, tokens, tokens, params, num_heads)
    assert out.shape == (B, N, C)
    assert jnp.allclose(out, ref, atol=2e-3, rtol=2e-3), "mismatch vs JAX reference"

    print("KERNEL_OK")
</pallas_src>

<mosaic_0001>
module attributes {stable_mosaic.version = 11 : i64} {
  func.func @_assign_attention_kernel(%arg0: i32, %arg1: memref<2x16x128xf32, #tpu.memory_space<vmem>>, %arg2: memref<2x128x128xf32, #tpu.memory_space<vmem>>, %arg3: memref<128x128xbf16, #tpu.memory_space<vmem>>, %arg4: memref<128x256xbf16, #tpu.memory_space<vmem>>, %arg5: memref<128x128xbf16, #tpu.memory_space<vmem>>, %arg6: memref<1x128xf32, #tpu.memory_space<vmem>>, %arg7: memref<2x16x128xf32, #tpu.memory_space<vmem>>) attributes {dimension_semantics = [#tpu.dimension_semantics<parallel>], iteration_bounds = array<i64: 2>, scalar_prefetch = 0 : i64, scratch_operands = 0 : i64, tpu.core_type = #tpu.core_type<tc>, window_params = [{transform_indices = @transform_0, window_bounds = array<i64: 2, 16, 128>}, {transform_indices = @transform_1, window_bounds = array<i64: 2, 128, 128>}, {pipeline_mode = #tpu.pipeline_mode<synchronous>, transform_indices = @transform_2, window_bounds = array<i64: 128, 128>}, {pipeline_mode = #tpu.pipeline_mode<synchronous>, transform_indices = @transform_3, window_bounds = array<i64: 128, 256>}, {pipeline_mode = #tpu.pipeline_mode<synchronous>, transform_indices = @transform_4, window_bounds = array<i64: 128, 128>}, {pipeline_mode = #tpu.pipeline_mode<synchronous>, transform_indices = @transform_5, window_bounds = array<i64: 1, 128>}, {transform_indices = @transform_6, window_bounds = array<i64: 2, 16, 128>}]} {
    %c0 = arith.constant 0 : index
    %c0_0 = arith.constant 0 : index
    %c0_1 = arith.constant 0 : index
    %0 = vector.load %arg1[%c0, %c0_0, %c0_1] : memref<2x16x128xf32, #tpu.memory_space<vmem>>, vector<2x16x128xf32>
    %1 = vector.shape_cast %0 : vector<2x16x128xf32> to vector<32x128xf32>
    %2 = arith.truncf %1 : vector<32x128xf32> to vector<32x128xbf16>
    %c0_2 = arith.constant 0 : index
    %c0_3 = arith.constant 0 : index
    %3 = vector.load %arg3[%c0_2, %c0_3] : memref<128x128xbf16, #tpu.memory_space<vmem>>, vector<128x128xbf16>
    %cst = arith.constant dense<0.000000e+00> : vector<32x128xf32>
    %4 = tpu.matmul %2, %3, %cst {dimension_numbers = #tpu.dot_dimension_numbers<[1], [0], [0], [1], [0, 0, 1, 1], [], []>} : vector<32x128xbf16>, vector<128x128xbf16>, vector<32x128xf32> -> vector<32x128xf32>
    %cst_4 = arith.constant 0.176776692 : f32
    %5 = vector.broadcast %cst_4 : f32 to vector<32x128xf32>
    %6 = arith.mulf %4, %5 : vector<32x128xf32>
    %7 = arith.truncf %6 : vector<32x128xf32> to vector<32x128xbf16>
    %c0_5 = arith.constant 0 : index
    %c0_6 = arith.constant 0 : index
    %c0_7 = arith.constant 0 : index
    %8 = vector.load %arg2[%c0_5, %c0_6, %c0_7] : memref<2x128x128xf32, #tpu.memory_space<vmem>>, vector<2x128x128xf32>
    %9 = vector.shape_cast %8 : vector<2x128x128xf32> to vector<256x128xf32>
    %10 = arith.truncf %9 : vector<256x128xf32> to vector<256x128xbf16>
    %c0_8 = arith.constant 0 : index
    %c0_9 = arith.constant 0 : index
    %11 = vector.load %arg4[%c0_8, %c0_9] : memref<128x256xbf16, #tpu.memory_space<vmem>>, vector<128x256xbf16>
    %cst_10 = arith.constant dense<0.000000e+00> : vector<256x256xf32>
    %12 = tpu.matmul %10, %11, %cst_10 {dimension_numbers = #tpu.dot_dimension_numbers<[1], [0], [0], [1], [0, 0, 1, 1], [], []>} : vector<256x128xbf16>, vector<128x256xbf16>, vector<256x256xf32> -> vector<256x256xf32>
    %13 = arith.truncf %12 : vector<256x256xf32> to vector<256x256xbf16>
    %14 = vector.extract_strided_slice %13 {offsets = [0, 0], sizes = [256, 128], strides = [1, 1]} : vector<256x256xbf16> to vector<256x128xbf16>
    %15 = vector.extract_strided_slice %13 {offsets = [0, 128], sizes = [256, 128], strides = [1, 1]} : vector<256x256xbf16> to vector<256x128xbf16>
    %16 = tpu.iota {dimensions = array<i32: 0>} : vector<16x128xi32>
    %17 = vector.extract_strided_slice %7 {offsets = [0, 0], sizes = [16, 32], strides = [1, 1]} : vector<32x128xbf16> to vector<16x32xbf16>
    %18 = vector.extract_strided_slice %14 {offsets = [0, 0], sizes = [128, 32], strides = [1, 1]} : vector<256x128xbf16> to vector<128x32xbf16>
    %19 = vector.extract_strided_slice %15 {offsets = [0, 0], sizes = [128, 32], strides = [1, 1]} : vector<256x128xbf16> to vector<128x32xbf16>
    %cst_11 = arith.constant dense<0.000000e+00> : vector<16x128xf32>
    %20 = tpu.matmul %17, %18, %cst_11 {dimension_numbers = #tpu.dot_dimension_numbers<[1], [1], [0], [0], [0, 0, 1, 0], [], []>} : vector<16x32xbf16>, vector<128x32xbf16>, vector<16x128xf32> -> vector<16x128xf32>
    %cst_12 = arith.constant dense<0xFF800000> : vector<128xf32>
    %21 = vector.multi_reduction <maximumf>, %20, %cst_12 [0] : vector<16x128xf32> to vector<128xf32>
    %22 = vector.shape_cast %21 : vector<128xf32> to vector<1x128xf32>
    %23 = vector.broadcast %22 : vector<1x128xf32> to vector<16x128xf32>
    %24 = arith.cmpf oeq, %20, %23 : vector<16x128xf32>
    %c16_i32 = arith.constant 16 : i32
    %25 = vector.broadcast %c16_i32 : i32 to vector<16x128xi32>
    %26 = arith.select %24, %16, %25 : vector<16x128xi1>, vector<16x128xi32>
    %cst_13 = arith.constant dense<2147483647> : vector<128xi32>
    %27 = vector.multi_reduction <minsi>, %26, %cst_13 [0] : vector<16x128xi32> to vector<128xi32>
    %28 = vector.shape_cast %27 : vector<128xi32> to vector<1x128xi32>
    %29 = vector.broadcast %28 : vector<1x128xi32> to vector<16x128xi32>
    %30 = arith.cmpi eq, %16, %29 : vector<16x128xi32>
    %31 = arith.extui %30 : vector<16x128xi1> to vector<16x128xi32>
    %32 = arith.sitofp %31 : vector<16x128xi32> to vector<16x128xf32>
    %cst_14 = arith.constant dense<0.000000e+00> : vector<16xf32>
    %33 = vector.multi_reduction <add>, %32, %cst_14 [1] : vector<16x128xf32> to vector<16xf32>
    %34 = vector.shape_cast %33 : vector<16xf32> to vector<16x1xf32>
    %cst_15 = arith.constant 1.000000e+00 : f32
    %35 = vector.broadcast %cst_15 : f32 to vector<16x1xf32>
    %36 = arith.addf %34, %35 : vector<16x1xf32>
    %37 = tpu.reciprocal %36 {approx = true} : vector<16x1xf32> -> vector<16x1xf32>
    %38 = vector.broadcast %37 : vector<16x1xf32> to vector<16x128xf32>
    %39 = arith.mulf %32, %38 : vector<16x128xf32>
    %40 = arith.truncf %39 : vector<16x128xf32> to vector<16x128xbf16>
    %cst_16 = arith.constant dense<0.000000e+00> : vector<16x32xf32>
    %41 = tpu.matmul %40, %19, %cst_16 {dimension_numbers = #tpu.dot_dimension_numbers<[1], [0], [0], [1], [0, 0, 1, 1], [], []>} : vector<16x128xbf16>, vector<128x32xbf16>, vector<16x32xf32> -> vector<16x32xf32>
    %42 = arith.truncf %41 : vector<16x32xf32> to vector<16x32xbf16>
    %43 = vector.extract_strided_slice %7 {offsets = [0, 32], sizes = [16, 32], strides = [1, 1]} : vector<32x128xbf16> to vector<16x32xbf16>
    %44 = vector.extract_strided_slice %14 {offsets = [0, 32], sizes = [128, 32], strides = [1, 1]} : vector<256x128xbf16> to vector<128x32xbf16>
    %45 = vector.extract_strided_slice %15 {offsets = [0, 32], sizes = [128, 32], strides = [1, 1]} : vector<256x128xbf16> to vector<128x32xbf16>
    %cst_17 = arith.constant dense<0.000000e+00> : vector<16x128xf32>
    %46 = tpu.matmul %43, %44, %cst_17 {dimension_numbers = #tpu.dot_dimension_numbers<[1], [1], [0], [0], [0, 0, 1, 0], [], []>} : vector<16x32xbf16>, vector<128x32xbf16>, vector<16x128xf32> -> vector<16x128xf32>
    %cst_18 = arith.constant dense<0xFF800000> : vector<128xf32>
    %47 = vector.multi_reduction <maximumf>, %46, %cst_18 [0] : vector<16x128xf32> to vector<128xf32>
    %48 = vector.shape_cast %47 : vector<128xf32> to vector<1x128xf32>
    %49 = vector.broadcast %48 : vector<1x128xf32> to vector<16x128xf32>
    %50 = arith.cmpf oeq, %46, %49 : vector<16x128xf32>
    %c16_i32_19 = arith.constant 16 : i32
    %51 = vector.broadcast %c16_i32_19 : i32 to vector<16x128xi32>
    %52 = arith.select %50, %16, %51 : vector<16x128xi1>, vector<16x128xi32>
    %cst_20 = arith.constant dense<2147483647> : vector<128xi32>
    %53 = vector.multi_reduction <minsi>, %52, %cst_20 [0] : vector<16x128xi32> to vector<128xi32>
    %54 = vector.shape_cast %53 : vector<128xi32> to vector<1x128xi32>
    %55 = vector.broadcast %54 : vector<1x128xi32> to vector<16x128xi32>
    %56 = arith.cmpi eq, %16, %55 : vector<16x128xi32>
    %57 = arith.extui %56 : vector<16x128xi1> to vector<16x128xi32>
    %58 = arith.sitofp %57 : vector<16x128xi32> to vector<16x128xf32>
    %cst_21 = arith.constant dense<0.000000e+00> : vector<16xf32>
    %59 = vector.multi_reduction <add>, %58, %cst_21 [1] : vector<16x128xf32> to vector<16xf32>
    %60 = vector.shape_cast %59 : vector<16xf32> to vector<16x1xf32>
    %cst_22 = arith.constant 1.000000e+00 : f32
    %61 = vector.broadcast %cst_22 : f32 to vector<16x1xf32>
    %62 = arith.addf %60, %61 : vector<16x1xf32>
    %63 = tpu.reciprocal %62 {approx = true} : vector<16x1xf32> -> vector<16x1xf32>
    %64 = vector.broadcast %63 : vector<16x1xf32> to vector<16x128xf32>
    %65 = arith.mulf %58, %64 : vector<16x128xf32>
    %66 = arith.truncf %65 : vector<16x128xf32> to vector<16x128xbf16>
    %cst_23 = arith.constant dense<0.000000e+00> : vector<16x32xf32>
    %67 = tpu.matmul %66, %45, %cst_23 {dimension_numbers = #tpu.dot_dimension_numbers<[1], [0], [0], [1], [0, 0, 1, 1], [], []>} : vector<16x128xbf16>, vector<128x32xbf16>, vector<16x32xf32> -> vector<16x32xf32>
    %68 = arith.truncf %67 : vector<16x32xf32> to vector<16x32xbf16>
    %69 = vector.extract_strided_slice %7 {offsets = [0, 64], sizes = [16, 32], strides = [1, 1]} : vector<32x128xbf16> to vector<16x32xbf16>
    %70 = vector.extract_strided_slice %14 {offsets = [0, 64], sizes = [128, 32], strides = [1, 1]} : vector<256x128xbf16> to vector<128x32xbf16>
    %71 = vector.extract_strided_slice %15 {offsets = [0, 64], sizes = [128, 32], strides = [1, 1]} : vector<256x128xbf16> to vector<128x32xbf16>
    %cst_24 = arith.constant dense<0.000000e+00> : vector<16x128xf32>
    %72 = tpu.matmul %69, %70, %cst_24 {dimension_numbers = #tpu.dot_dimension_numbers<[1], [1], [0], [0], [0, 0, 1, 0], [], []>} : vector<16x32xbf16>, vector<128x32xbf16>, vector<16x128xf32> -> vector<16x128xf32>
    %cst_25 = arith.constant dense<0xFF800000> : vector<128xf32>
    %73 = vector.multi_reduction <maximumf>, %72, %cst_25 [0] : vector<16x128xf32> to vector<128xf32>
    %74 = vector.shape_cast %73 : vector<128xf32> to vector<1x128xf32>
    %75 = vector.broadcast %74 : vector<1x128xf32> to vector<16x128xf32>
    %76 = arith.cmpf oeq, %72, %75 : vector<16x128xf32>
    %c16_i32_26 = arith.constant 16 : i32
    %77 = vector.broadcast %c16_i32_26 : i32 to vector<16x128xi32>
    %78 = arith.select %76, %16, %77 : vector<16x128xi1>, vector<16x128xi32>
    %cst_27 = arith.constant dense<2147483647> : vector<128xi32>
    %79 = vector.multi_reduction <minsi>, %78, %cst_27 [0] : vector<16x128xi32> to vector<128xi32>
    %80 = vector.shape_cast %79 : vector<128xi32> to vector<1x128xi32>
    %81 = vector.broadcast %80 : vector<1x128xi32> to vector<16x128xi32>
    %82 = arith.cmpi eq, %16, %81 : vector<16x128xi32>
    %83 = arith.extui %82 : vector<16x128xi1> to vector<16x128xi32>
    %84 = arith.sitofp %83 : vector<16x128xi32> to vector<16x128xf32>
    %cst_28 = arith.constant dense<0.000000e+00> : vector<16xf32>
    %85 = vector.multi_reduction <add>, %84, %cst_28 [1] : vector<16x128xf32> to vector<16xf32>
    %86 = vector.shape_cast %85 : vector<16xf32> to vector<16x1xf32>
    %cst_29 = arith.constant 1.000000e+00 : f32
    %87 = vector.broadcast %cst_29 : f32 to vector<16x1xf32>
    %88 = arith.addf %86, %87 : vector<16x1xf32>
    %89 = tpu.reciprocal %88 {approx = true} : vector<16x1xf32> -> vector<16x1xf32>
    %90 = vector.broadcast %89 : vector<16x1xf32> to vector<16x128xf32>
    %91 = arith.mulf %84, %90 : vector<16x128xf32>
    %92 = arith.truncf %91 : vector<16x128xf32> to vector<16x128xbf16>
    %cst_30 = arith.constant dense<0.000000e+00> : vector<16x32xf32>
    %93 = tpu.matmul %92, %71, %cst_30 {dimension_numbers = #tpu.dot_dimension_numbers<[1], [0], [0], [1], [0, 0, 1, 1], [], []>} : vector<16x128xbf16>, vector<128x32xbf16>, vector<16x32xf32> -> vector<16x32xf32>
    %94 = arith.truncf %93 : vector<16x32xf32> to vector<16x32xbf16>
    %95 = vector.extract_strided_slice %7 {offsets = [0, 96], sizes = [16, 32], strides = [1, 1]} : vector<32x128xbf16> to vector<16x32xbf16>
    %96 = vector.extract_strided_slice %14 {offsets = [0, 96], sizes = [128, 32], strides = [1, 1]} : vector<256x128xbf16> to vector<128x32xbf16>
    %97 = vector.extract_strided_slice %15 {offsets = [0, 96], sizes = [128, 32], strides = [1, 1]} : vector<256x128xbf16> to vector<128x32xbf16>
    %cst_31 = arith.constant dense<0.000000e+00> : vector<16x128xf32>
    %98 = tpu.matmul %95, %96, %cst_31 {dimension_numbers = #tpu.dot_dimension_numbers<[1], [1], [0], [0], [0, 0, 1, 0], [], []>} : vector<16x32xbf16>, vector<128x32xbf16>, vector<16x128xf32> -> vector<16x128xf32>
    %cst_32 = arith.constant dense<0xFF800000> : vector<128xf32>
    %99 = vector.multi_reduction <maximumf>, %98, %cst_32 [0] : vector<16x128xf32> to vector<128xf32>
    %100 = vector.shape_cast %99 : vector<128xf32> to vector<1x128xf32>
    %101 = vector.broadcast %100 : vector<1x128xf32> to vector<16x128xf32>
    %102 = arith.cmpf oeq, %98, %101 : vector<16x128xf32>
    %c16_i32_33 = arith.constant 16 : i32
    %103 = vector.broadcast %c16_i32_33 : i32 to vector<16x128xi32>
    %104 = arith.select %102, %16, %103 : vector<16x128xi1>, vector<16x128xi32>
    %cst_34 = arith.constant dense<2147483647> : vector<128xi32>
    %105 = vector.multi_reduction <minsi>, %104, %cst_34 [0] : vector<16x128xi32> to vector<128xi32>
    %106 = vector.shape_cast %105 : vector<128xi32> to vector<1x128xi32>
    %107 = vector.broadcast %106 : vector<1x128xi32> to vector<16x128xi32>
    %108 = arith.cmpi eq, %16, %107 : vector<16x128xi32>
    %109 = arith.extui %108 : vector<16x128xi1> to vector<16x128xi32>
    %110 = arith.sitofp %109 : vector<16x128xi32> to vector<16x128xf32>
    %cst_35 = arith.constant dense<0.000000e+00> : vector<16xf32>
    %111 = vector.multi_reduction <add>, %110, %cst_35 [1] : vector<16x128xf32> to vector<16xf32>
    %112 = vector.shape_cast %111 : vector<16xf32> to vector<16x1xf32>
    %cst_36 = arith.constant 1.000000e+00 : f32
    %113 = vector.broadcast %cst_36 : f32 to vector<16x1xf32>
    %114 = arith.addf %112, %113 : vector<16x1xf32>
    %115 = tpu.reciprocal %114 {approx = true} : vector<16x1xf32> -> vector<16x1xf32>
    %116 = vector.broadcast %115 : vector<16x1xf32> to vector<16x128xf32>
    %117 = arith.mulf %110, %116 : vector<16x128xf32>
    %118 = arith.truncf %117 : vector<16x128xf32> to vector<16x128xbf16>
    %cst_37 = arith.constant dense<0.000000e+00> : vector<16x32xf32>
    %119 = tpu.matmul %118, %97, %cst_37 {dimension_numbers = #tpu.dot_dimension_numbers<[1], [0], [0], [1], [0, 0, 1, 1], [], []>} : vector<16x128xbf16>, vector<128x32xbf16>, vector<16x32xf32> -> vector<16x32xf32>
    %120 = arith.truncf %119 : vector<16x32xf32> to vector<16x32xbf16>
    %121 = tpu.concatenate %42, %68, %94, %120 in 1 : vector<16x32xbf16>, vector<16x32xbf16>, vector<16x32xbf16>, vector<16x32xbf16> -> vector<16x128xbf16>
    %122 = vector.extract_strided_slice %7 {offsets = [16, 0], sizes = [16, 32], strides = [1, 1]} : vector<32x128xbf16> to vector<16x32xbf16>
    %123 = vector.extract_strided_slice %14 {offsets = [128, 0], sizes = [128, 32], strides = [1, 1]} : vector<256x128xbf16> to vector<128x32xbf16>
    %124 = vector.extract_strided_slice %15 {offsets = [128, 0], sizes = [128, 32], strides = [1, 1]} : vector<256x128xbf16> to vector<128x32xbf16>
    %cst_38 = arith.constant dense<0.000000e+00> : vector<16x128xf32>
    %125 = tpu.matmul %122, %123, %cst_38 {dimension_numbers = #tpu.dot_dimension_numbers<[1], [1], [0], [0], [0, 0, 1, 0], [], []>} : vector<16x32xbf16>, vector<128x32xbf16>, vector<16x128xf32> -> vector<16x128xf32>
    %cst_39 = arith.constant dense<0xFF800000> : vector<128xf32>
    %126 = vector.multi_reduction <maximumf>, %125, %cst_39 [0] : vector<16x128xf32> to vector<128xf32>
    %127 = vector.shape_cast %126 : vector<128xf32> to vector<1x128xf32>
    %128 = vector.broadcast %127 : vector<1x128xf32> to vector<16x128xf32>
    %129 = arith.cmpf oeq, %125, %128 : vector<16x128xf32>
    %c16_i32_40 = arith.constant 16 : i32
    %130 = vector.broadcast %c16_i32_40 : i32 to vector<16x128xi32>
    %131 = arith.select %129, %16, %130 : vector<16x128xi1>, vector<16x128xi32>
    %cst_41 = arith.constant dense<2147483647> : vector<128xi32>
    %132 = vector.multi_reduction <minsi>, %131, %cst_41 [0] : vector<16x128xi32> to vector<128xi32>
    %133 = vector.shape_cast %132 : vector<128xi32> to vector<1x128xi32>
    %134 = vector.broadcast %133 : vector<1x128xi32> to vector<16x128xi32>
    %135 = arith.cmpi eq, %16, %134 : vector<16x128xi32>
    %136 = arith.extui %135 : vector<16x128xi1> to vector<16x128xi32>
    %137 = arith.sitofp %136 : vector<16x128xi32> to vector<16x128xf32>
    %cst_42 = arith.constant dense<0.000000e+00> : vector<16xf32>
    %138 = vector.multi_reduction <add>, %137, %cst_42 [1] : vector<16x128xf32> to vector<16xf32>
    %139 = vector.shape_cast %138 : vector<16xf32> to vector<16x1xf32>
    %cst_43 = arith.constant 1.000000e+00 : f32
    %140 = vector.broadcast %cst_43 : f32 to vector<16x1xf32>
    %141 = arith.addf %139, %140 : vector<16x1xf32>
    %142 = tpu.reciprocal %141 {approx = true} : vector<16x1xf32> -> vector<16x1xf32>
    %143 = vector.broadcast %142 : vector<16x1xf32> to vector<16x128xf32>
    %144 = arith.mulf %137, %143 : vector<16x128xf32>
    %145 = arith.truncf %144 : vector<16x128xf32> to vector<16x128xbf16>
    %cst_44 = arith.constant dense<0.000000e+00> : vector<16x32xf32>
    %146 = tpu.matmul %145, %124, %cst_44 {dimension_numbers = #tpu.dot_dimension_numbers<[1], [0], [0], [1], [0, 0, 1, 1], [], []>} : vector<16x128xbf16>, vector<128x32xbf16>, vector<16x32xf32> -> vector<16x32xf32>
    %147 = arith.truncf %146 : vector<16x32xf32> to vector<16x32xbf16>
    %148 = vector.extract_strided_slice %7 {offsets = [16, 32], sizes = [16, 32], strides = [1, 1]} : vector<32x128xbf16> to vector<16x32xbf16>
    %149 = vector.extract_strided_slice %14 {offsets = [128, 32], sizes = [128, 32], strides = [1, 1]} : vector<256x128xbf16> to vector<128x32xbf16>
    %150 = vector.extract_strided_slice %15 {offsets = [128, 32], sizes = [128, 32], strides = [1, 1]} : vector<256x128xbf16> to vector<128x32xbf16>
    %cst_45 = arith.constant dense<0.000000e+00> : vector<16x128xf32>
    %151 = tpu.matmul %148, %149, %cst_45 {dimension_numbers = #tpu.dot_dimension_numbers<[1], [1], [0], [0], [0, 0, 1, 0], [], []>} : vector<16x32xbf16>, vector<128x32xbf16>, vector<16x128xf32> -> vector<16x128xf32>
    %cst_46 = arith.constant dense<0xFF800000> : vector<128xf32>
    %152 = vector.multi_reduction <maximumf>, %151, %cst_46 [0] : vector<16x128xf32> to vector<128xf32>
    %153 = vector.shape_cast %152 : vector<128xf32> to vector<1x128xf32>
    %154 = vector.broadcast %153 : vector<1x128xf32> to vector<16x128xf32>
    %155 = arith.cmpf oeq, %151, %154 : vector<16x128xf32>
    %c16_i32_47 = arith.constant 16 : i32
    %156 = vector.broadcast %c16_i32_47 : i32 to vector<16x128xi32>
    %157 = arith.select %155, %16, %156 : vector<16x128xi1>, vector<16x128xi32>
    %cst_48 = arith.constant dense<2147483647> : vector<128xi32>
    %158 = vector.multi_reduction <minsi>, %157, %cst_48 [0] : vector<16x128xi32> to vector<128xi32>
    %159 = vector.shape_cast %158 : vector<128xi32> to vector<1x128xi32>
    %160 = vector.broadcast %159 : vector<1x128xi32> to vector<16x128xi32>
    %161 = arith.cmpi eq, %16, %160 : vector<16x128xi32>
    %162 = arith.extui %161 : vector<16x128xi1> to vector<16x128xi32>
    %163 = arith.sitofp %162 : vector<16x128xi32> to vector<16x128xf32>
    %cst_49 = arith.constant dense<0.000000e+00> : vector<16xf32>
    %164 = vector.multi_reduction <add>, %163, %cst_49 [1] : vector<16x128xf32> to vector<16xf32>
    %165 = vector.shape_cast %164 : vector<16xf32> to vector<16x1xf32>
    %cst_50 = arith.constant 1.000000e+00 : f32
    %166 = vector.broadcast %cst_50 : f32 to vector<16x1xf32>
    %167 = arith.addf %165, %166 : vector<16x1xf32>
    %168 = tpu.reciprocal %167 {approx = true} : vector<16x1xf32> -> vector<16x1xf32>
    %169 = vector.broadcast %168 : vector<16x1xf32> to vector<16x128xf32>
    %170 = arith.mulf %163, %169 : vector<16x128xf32>
    %171 = arith.truncf %170 : vector<16x128xf32> to vector<16x128xbf16>
    %cst_51 = arith.constant dense<0.000000e+00> : vector<16x32xf32>
    %172 = tpu.matmul %171, %150, %cst_51 {dimension_numbers = #tpu.dot_dimension_numbers<[1], [0], [0], [1], [0, 0, 1, 1], [], []>} : vector<16x128xbf16>, vector<128x32xbf16>, vector<16x32xf32> -> vector<16x32xf32>
    %173 = arith.truncf %172 : vector<16x32xf32> to vector<16x32xbf16>
    %174 = vector.extract_strided_slice %7 {offsets = [16, 64], sizes = [16, 32], strides = [1, 1]} : vector<32x128xbf16> to vector<16x32xbf16>
    %175 = vector.extract_strided_slice %14 {offsets = [128, 64], sizes = [128, 32], strides = [1, 1]} : vector<256x128xbf16> to vector<128x32xbf16>
    %176 = vector.extract_strided_slice %15 {offsets = [128, 64], sizes = [128, 32], strides = [1, 1]} : vector<256x128xbf16> to vector<128x32xbf16>
    %cst_52 = arith.constant dense<0.000000e+00> : vector<16x128xf32>
    %177 = tpu.matmul %174, %175, %cst_52 {dimension_numbers = #tpu.dot_dimension_numbers<[1], [1], [0], [0], [0, 0, 1, 0], [], []>} : vector<16x32xbf16>, vector<128x32xbf16>, vector<16x128xf32> -> vector<16x128xf32>
    %cst_53 = arith.constant dense<0xFF800000> : vector<128xf32>
    %178 = vector.multi_reduction <maximumf>, %177, %cst_53 [0] : vector<16x128xf32> to vector<128xf32>
    %179 = vector.shape_cast %178 : vector<128xf32> to vector<1x128xf32>
    %180 = vector.broadcast %179 : vector<1x128xf32> to vector<16x128xf32>
    %181 = arith.cmpf oeq, %177, %180 : vector<16x128xf32>
    %c16_i32_54 = arith.constant 16 : i32
    %182 = vector.broadcast %c16_i32_54 : i32 to vector<16x128xi32>
    %183 = arith.select %181, %16, %182 : vector<16x128xi1>, vector<16x128xi32>
    %cst_55 = arith.constant dense<2147483647> : vector<128xi32>
    %184 = vector.multi_reduction <minsi>, %183, %cst_55 [0] : vector<16x128xi32> to vector<128xi32>
    %185 = vector.shape_cast %184 : vector<128xi32> to vector<1x128xi32>
    %186 = vector.broadcast %185 : vector<1x128xi32> to vector<16x128xi32>
    %187 = arith.cmpi eq, %16, %186 : vector<16x128xi32>
    %188 = arith.extui %187 : vector<16x128xi1> to vector<16x128xi32>
    %189 = arith.sitofp %188 : vector<16x128xi32> to vector<16x128xf32>
    %cst_56 = arith.constant dense<0.000000e+00> : vector<16xf32>
    %190 = vector.multi_reduction <add>, %189, %cst_56 [1] : vector<16x128xf32> to vector<16xf32>
    %191 = vector.shape_cast %190 : vector<16xf32> to vector<16x1xf32>
    %cst_57 = arith.constant 1.000000e+00 : f32
    %192 = vector.broadcast %cst_57 : f32 to vector<16x1xf32>
    %193 = arith.addf %191, %192 : vector<16x1xf32>
    %194 = tpu.reciprocal %193 {approx = true} : vector<16x1xf32> -> vector<16x1xf32>
    %195 = vector.broadcast %194 : vector<16x1xf32> to vector<16x128xf32>
    %196 = arith.mulf %189, %195 : vector<16x128xf32>
    %197 = arith.truncf %196 : vector<16x128xf32> to vector<16x128xbf16>
    %cst_58 = arith.constant dense<0.000000e+00> : vector<16x32xf32>
    %198 = tpu.matmul %197, %176, %cst_58 {dimension_numbers = #tpu.dot_dimension_numbers<[1], [0], [0], [1], [0, 0, 1, 1], [], []>} : vector<16x128xbf16>, vector<128x32xbf16>, vector<16x32xf32> -> vector<16x32xf32>
    %199 = arith.truncf %198 : vector<16x32xf32> to vector<16x32xbf16>
    %200 = vector.extract_strided_slice %7 {offsets = [16, 96], sizes = [16, 32], strides = [1, 1]} : vector<32x128xbf16> to vector<16x32xbf16>
    %201 = vector.extract_strided_slice %14 {offsets = [128, 96], sizes = [128, 32], strides = [1, 1]} : vector<256x128xbf16> to vector<128x32xbf16>
    %202 = vector.extract_strided_slice %15 {offsets = [128, 96], sizes = [128, 32], strides = [1, 1]} : vector<256x128xbf16> to vector<128x32xbf16>
    %cst_59 = arith.constant dense<0.000000e+00> : vector<16x128xf32>
    %203 = tpu.matmul %200, %201, %cst_59 {dimension_numbers = #tpu.dot_dimension_numbers<[1], [1], [0], [0], [0, 0, 1, 0], [], []>} : vector<16x32xbf16>, vector<128x32xbf16>, vector<16x128xf32> -> vector<16x128xf32>
    %cst_60 = arith.constant dense<0xFF800000> : vector<128xf32>
    %204 = vector.multi_reduction <maximumf>, %203, %cst_60 [0] : vector<16x128xf32> to vector<128xf32>
    %205 = vector.shape_cast %204 : vector<128xf32> to vector<1x128xf32>
    %206 = vector.broadcast %205 : vector<1x128xf32> to vector<16x128xf32>
    %207 = arith.cmpf oeq, %203, %206 : vector<16x128xf32>
    %c16_i32_61 = arith.constant 16 : i32
    %208 = vector.broadcast %c16_i32_61 : i32 to vector<16x128xi32>
    %209 = arith.select %207, %16, %208 : vector<16x128xi1>, vector<16x128xi32>
    %cst_62 = arith.constant dense<2147483647> : vector<128xi32>
    %210 = vector.multi_reduction <minsi>, %209, %cst_62 [0] : vector<16x128xi32> to vector<128xi32>
    %211 = vector.shape_cast %210 : vector<128xi32> to vector<1x128xi32>
    %212 = vector.broadcast %211 : vector<1x128xi32> to vector<16x128xi32>
    %213 = arith.cmpi eq, %16, %212 : vector<16x128xi32>
    %214 = arith.extui %213 : vector<16x128xi1> to vector<16x128xi32>
    %215 = arith.sitofp %214 : vector<16x128xi32> to vector<16x128xf32>
    %cst_63 = arith.constant dense<0.000000e+00> : vector<16xf32>
    %216 = vector.multi_reduction <add>, %215, %cst_63 [1] : vector<16x128xf32> to vector<16xf32>
    %217 = vector.shape_cast %216 : vector<16xf32> to vector<16x1xf32>
    %cst_64 = arith.constant 1.000000e+00 : f32
    %218 = vector.broadcast %cst_64 : f32 to vector<16x1xf32>
    %219 = arith.addf %217, %218 : vector<16x1xf32>
    %220 = tpu.reciprocal %219 {approx = true} : vector<16x1xf32> -> vector<16x1xf32>
    %221 = vector.broadcast %220 : vector<16x1xf32> to vector<16x128xf32>
    %222 = arith.mulf %215, %221 : vector<16x128xf32>
    %223 = arith.truncf %222 : vector<16x128xf32> to vector<16x128xbf16>
    %cst_65 = arith.constant dense<0.000000e+00> : vector<16x32xf32>
    %224 = tpu.matmul %223, %202, %cst_65 {dimension_numbers = #tpu.dot_dimension_numbers<[1], [0], [0], [1], [0, 0, 1, 1], [], []>} : vector<16x128xbf16>, vector<128x32xbf16>, vector<16x32xf32> -> vector<16x32xf32>
    %225 = arith.truncf %224 : vector<16x32xf32> to vector<16x32xbf16>
    %226 = tpu.concatenate %147, %173, %199, %225 in 1 : vector<16x32xbf16>, vector<16x32xbf16>, vector<16x32xbf16>, vector<16x32xbf16> -> vector<16x128xbf16>
    %227 = tpu.concatenate %121, %226 in 0 : vector<16x128xbf16>, vector<16x128xbf16> -> vector<32x128xbf16>
    %c0_66 = arith.constant 0 : index
    %c0_67 = arith.constant 0 : index
    %228 = vector.load %arg5[%c0_66, %c0_67] : memref<128x128xbf16, #tpu.memory_space<vmem>>, vector<128x128xbf16>
    %cst_68 = arith.constant dense<0.000000e+00> : vector<32x128xf32>
    %229 = tpu.matmul %227, %228, %cst_68 {dimension_numbers = #tpu.dot_dimension_numbers<[1], [0], [0], [1], [0, 0, 1, 1], [], []>} : vector<32x128xbf16>, vector<128x128xbf16>, vector<32x128xf32> -> vector<32x128xf32>
    %c0_69 = arith.constant 0 : index
    %c0_70 = arith.constant 0 : index
    %230 = vector.load %arg6[%c0_69, %c0_70] : memref<1x128xf32, #tpu.memory_space<vmem>>, vector<1x128xf32>
    %231 = vector.shape_cast %230 : vector<1x128xf32> to vector<128xf32>
    %232 = vector.shape_cast %231 : vector<128xf32> to vector<1x128xf32>
    %233 = vector.broadcast %232 : vector<1x128xf32> to vector<32x128xf32>
    %234 = arith.addf %229, %233 : vector<32x128xf32>
    %235 = vector.shape_cast %234 : vector<32x128xf32> to vector<2x16x128xf32>
    %c0_71 = arith.constant 0 : index
    %c0_72 = arith.constant 0 : index
    %c0_73 = arith.constant 0 : index
    %236 = vector.load %arg7[%c0_71, %c0_72, %c0_73] : memref<2x16x128xf32, #tpu.memory_space<vmem>>, vector<2x16x128xf32>
    tpu.vector_store %arg7[%c0_71, %c0_72, %c0_73], %235 {strides = array<i32>} : memref<2x16x128xf32, #tpu.memory_space<vmem>>, vector<2x16x128xf32>,
    return
  }
  func.func @transform_0(%arg0: i32) -> (i32, i32, i32) {
    %c0_i32 = arith.constant 0 : i32
    %c0_i32_0 = arith.constant 0 : i32
    %c0_i32_1 = arith.constant 0 : i32
    return %arg0, %c0_i32, %c0_i32_0 : i32, i32, i32
  }
  func.func @transform_1(%arg0: i32) -> (i32, i32, i32) {
    %c0_i32 = arith.constant 0 : i32
    %c0_i32_0 = arith.constant 0 : i32
    %c0_i32_1 = arith.constant 0 : i32
    return %arg0, %c0_i32, %c0_i32_0 : i32, i32, i32
  }
  func.func @transform_2(%arg0: i32) -> (i32, i32) {
    %c0_i32 = arith.constant 0 : i32
    %c0_i32_0 = arith.constant 0 : i32
    %c0_i32_1 = arith.constant 0 : i32
    return %c0_i32, %c0_i32_0 : i32, i32
  }
  func.func @transform_3(%arg0: i32) -> (i32, i32) {
    %c0_i32 = arith.constant 0 : i32
    %c0_i32_0 = arith.constant 0 : i32
    %c0_i32_1 = arith.constant 0 : i32
    return %c0_i32, %c0_i32_0 : i32, i32
  }
  func.func @transform_4(%arg0: i32) -> (i32, i32) {
    %c0_i32 = arith.constant 0 : i32
    %c0_i32_0 = arith.constant 0 : i32
    %c0_i32_1 = arith.constant 0 : i32
    return %c0_i32, %c0_i32_0 : i32, i32
  }
  func.func @transform_5(%arg0: i32) -> (i32, i32) {
    %c0_i32 = arith.constant 0 : i32
    %c0_i32_0 = arith.constant 0 : i32
    %c0_i32_1 = arith.constant 0 : i32
    return %c0_i32, %c0_i32_0 : i32, i32
  }
  func.func @transform_6(%arg0: i32) -> (i32, i32, i32) {
    %c0_i32 = arith.constant 0 : i32
    %c0_i32_0 = arith.constant 0 : i32
    %c0_i32_1 = arith.constant 0 : i32
    return %arg0, %c0_i32, %c0_i32_0 : i32, i32, i32
  }
}

</mosaic_0001>

<bundles_post_ra>
// kernel: tpu_custom_call.1
= control target key start
LH: loop header
LB: loop body
LE: loop exit
PB: predicated region body
PF: predicated region fallthrough
CT: control target
= control target key end

     0   :  { %s4743_s0 = inlined_call_operand.hbm [shape: f32[4,16,128], index: 0, kind: input, shape index: {}]   ;;  %s4744_s1 = inlined_call_operand.hbm [shape: f32[4,128,128], index: 1, kind: input, shape index: {}]   ;;  %s4745_s2 = inlined_call_operand.hbm [shape: bf16[128,128], index: 2, kind: input, shape index: {}]   ;;  %s4746_s3 = inlined_call_operand.hbm [shape: bf16[128,256], index: 3, kind: input, shape index: {}]   ;;  %s4747_s4 = inlined_call_operand.hbm [shape: bf16[128,128], index: 4, kind: input, shape index: {}]   ;;  %s4748_s5 = inlined_call_operand.vmem [shape: f32[1,128], index: 5, kind: input, shape index: {}]   ;;  %s4749_s6 = inlined_call_operand.hbm [shape: f32[4,16,128], index: 6, kind: output, shape index: {}]  }
   0x1   :  { %4755 = sst [smem:[#allocation17_spill]] %s4743_s0 }
   0x2   :  { %4756 = sst [smem:[#allocation18_spill]] %s4745_s2 }
   0x3   :  { %4757 = sst [smem:[#allocation19_spill]] %s4746_s3 }
   0x4   :  { %4758 = sst [smem:[#allocation20_spill]] %s4747_s4 }
   0x5   :  { %11 = vsyncpa [#allocation3], 0 }
   0x6   :  { %13 = vsyncpa [#allocation3 + $0x1], 0 }
   0x7   :  { %14 = vsyncpa [#allocation6], 0 }
   0x8   :  { %16 = vsyncpa [#allocation6 + $0x1], 0 }
   0x9   :  { %17 = vsyncpa [#allocation9], 0 }
   0xa   :  { %18 = vsyncpa [#allocation4], 0 }
   0xb   :  { %20 = vsyncpa [#allocation4 + $0x1], 0  ;;  %s3691_s21 = smov 0   ;;  %s3693_s22 = smov 0  }
   0xc   :  { %s3695_s23 = smov 0   ;;  %s3697_s24 = smov 0  }
   0xd LB: > { %s3712_s25 = sadd.s32 4294967295, %s3636_s24   ;;  %s2634_s26 = sadd.s32 4294967294, %s3636_s24   ;;  %s3636_s24 = sphi %s3697_s24, %s4785_s24   ;;  %s3632_s23 = sphi %s3695_s23, %s4784_s23   ;;  %s3628_s22 = sphi %s3693_s22, %s4783_s22   ;;  %s3624_s21 = sphi %s3691_s21, %s4782_s21  }
   0xe   : > { %p46_p0 = scmp.ne.s32.totalorder %s3628_s22, %s3624_s21  ;;  %p4750_p1 = scmp.eq.s32.totalorder %s3712_s25, 0 }
   0xf   : > { %p186_p3 = scmp.eq.s32.totalorder %s2634_s26, 1  ;;  %p2635_p5 = scmp.ge.s32.totalorder %s3636_s24, 1 }
  0x10   : > { %p3721_p4 = por %p4750_p1, %p46_p0  ;;  %p193_p7 = scmp.lt.s32.totalorder %s3636_s24, 3 }
  0x11   : > { %p3726_p6 = por %p186_p3, %p46_p0  ;;  %s3638_s30 = smov [#allocation7]  }
  0x12   : > { %s4759_s27 = scalar_select %p3721_p4, 1, 0 }
  0x13   : > { %s4760_s28 = scalar_select %p3726_p6, 1, 0 }
  0x14   : > { %p3731_p8 = pnand %p2635_p5, %p193_p7  ;;  %s205_s7 = sshll.u32 %s3638_s30, 4  ;;  %s3735_s7 = int_to_ptr.vmem [resolvable:$true] %s205_s7 }
  0x15   : > { %s3639_s9 = smov [#allocation8]   ;;  %s4763_s2 = sld [smem:[#allocation18_spill]] }
  0x16   : > { %s4761_s29 = scalar_select %p3731_p8, 1, 0 }
  0x17   : > { %p3266_p9 = pneg %p3731_p8  ;;  %s218_s10 = sshll.u32 %s3639_s9, 4  ;;  %s3746_s10 = int_to_ptr.vmem [resolvable:$true] %s218_s10 }
  0x19   : > { %p3742_p11 = pnand %p3266_p9, %p4750_p1 }
  0x1b   : > { %s3414_s13 = scalar_lea.hbm %s4763_s2, 1024  ;;  %p3756_p13 = pneg %p3742_p11 }
  0x1c   : > { %p3415_p12 = scmp.ne.s32.totalorder %s4763_s2, %s3414_s13  ;;  %p3421_p5 = scmp.lt.u32.totalorder %s3414_s13, %s4763_s2 }
  0x1e   : > { %p3417_p0 = pnand %p3756_p13, %p3415_p12 }
  0x20   : > { %p3418_p3 = pneg %p3417_p0 }
  0x22   : > { %p3423_p7 = pnand %p3421_p5, %p3418_p3 }
  0x24   : > { %3426 = shalt.err (!%p3423_p7)
}
  0x25   : > { %s3427_s19 = scalar_lea.vmem %s3735_s7, 1024  ;;  %p3435_p2 = scmp.lt.s32.totalorder %s3735_s7, %s3735_s7 }
  0x26   : > { %p3428_p9 = scmp.ne.s32.totalorder %s3735_s7, %s3427_s19  ;;  %p3436_p6 = scmp.lt.s32.totalorder %s3427_s19, %s3427_s19 }
  0x28   : > { %p3430_p10 = pnand %p3428_p9, %p3756_p13  ;;  %p3437_p12 = por %p3436_p6, %p3435_p2 }
  0x2a   : > { %p3431_p1 = pneg %p3430_p10 }
  0x2c   : > { %p3438_p0 = pnand %p3437_p12, %p3431_p1 }
  0x2e   : > { %3441 = shalt.err (!%p3438_p0)
}
  0x2f   : > { %s4751_s20 = smov 64   ;;  %s4752_s26 = smov 4  }
  0x30   : > { %3269 = dma.hbm_to_vmem [thread:$0]  (!%p3742_p11), %s4763_s2, 1024, %s3735_s7, [#allocation6], %s4751_s20, %s4751_s20, %s4752_s26  }
  0x31   : > { %s4765_s3 = sld [smem:[#allocation19_spill]] }
  0x37   : > { %s3442_s13 = scalar_lea.hbm %s4765_s3, 2048 }
  0x38   : > { %p3443_p1 = scmp.ne.s32.totalorder %s4765_s3, %s3442_s13  ;;  %p3449_p10 = scmp.lt.u32.totalorder %s3442_s13, %s4765_s3 }
  0x3a   : > { %p3445_p2 = pnand %p3443_p1, %p3756_p13 }
  0x3c   : > { %p3446_p6 = pneg %p3445_p2 }
  0x3e   : > { %p3451_p3 = pnand %p3449_p10, %p3446_p6 }
  0x40   : > { %3454 = shalt.err (!%p3451_p3)
}
  0x41   : > { %s3455_s7 = scalar_lea.vmem %s3746_s10, 2048  ;;  %p3463_p12 = scmp.lt.s32.totalorder %s3746_s10, %s3746_s10 }
  0x42   : > { %p3456_p5 = scmp.ne.s32.totalorder %s3746_s10, %s3455_s7  ;;  %p3464_p0 = scmp.lt.s32.totalorder %s3455_s7, %s3455_s7 }
  0x44   : > { %p3458_p7 = pnand %p3456_p5, %p3756_p13  ;;  %p3465_p1 = por %p3464_p0, %p3463_p12 }
  0x46   : > { %p3459_p9 = pneg %p3458_p7 }
  0x48   : > { %p3466_p2 = pnand %p3465_p1, %p3459_p9 }
  0x4a   : > { %3469 = shalt.err (!%p3466_p2)
}
  0x4b   : > { %s3642_s19 = smov 128   ;;  %s3643_s30 = smov 8  }
  0x4c   : > { %3272 = dma.hbm_to_vmem [thread:$0]  (!%p3742_p11), %s4765_s3, 2048, %s3746_s10, [#allocation9], %s3642_s19, %s3642_s19, %s3643_s30  }
  0x4d   : > { %s3644_s12 = smov [#allocation10]   ;;  %s3807_s14 = sadd.s32 1, %s3636_s24  }
  0x4e   : > { %s231_s13 = sshll.u32 %s3644_s12, 4  ;;  %s4766_s4 = sld [smem:[#allocation20_spill]]  ;;  %s232_s13 = int_to_ptr.vmem [resolvable:$true] %s231_s13 }
  0x54   : > { %s3470_s18 = scalar_lea.hbm %s4766_s4, 1024 }
  0x55   : > { %p3471_p6 = scmp.ne.s32.totalorder %s4766_s4, %s3470_s18  ;;  %p3477_p5 = scmp.lt.u32.totalorder %s3470_s18, %s4766_s4 }
  0x57   : > { %p3473_p10 = pnand %p3471_p6, %p3756_p13 }
  0x59   : > { %p3474_p3 = pneg %p3473_p10 }
  0x5b   : > { %p3479_p7 = pnand %p3477_p5, %p3474_p3 }
  0x5d   : > { %3482 = shalt.err (!%p3479_p7)
}
  0x5e   : > { %s3483_s10 = scalar_lea.vmem %s232_s13, 1024  ;;  %p3491_p1 = scmp.lt.s32.totalorder %s232_s13, %s232_s13 }
  0x5f   : > { %p3484_p9 = scmp.ne.s32.totalorder %s232_s13, %s3483_s10  ;;  %p3492_p2 = scmp.lt.s32.totalorder %s3483_s10, %s3483_s10 }
  0x61   : > { %p3486_p12 = pnand %p3484_p9, %p3756_p13  ;;  %p3493_p4 = por %p3492_p2, %p3491_p1 }
  0x63   : > { %p3487_p0 = pneg %p3486_p12 }
  0x65   : > { %p3494_p8 = pnand %p3493_p4, %p3487_p0 }
  0x67   : > { %3497 = shalt.err (!%p3494_p8)
}
  0x68   : > { %s4767_s20 = smov 4   ;;  %s4768_s9 = smov 64  }
  0x69   : > { %3275 = dma.hbm_to_vmem [thread:$0]  (!%p3742_p11), %s4766_s4, 1024, %s232_s13, [#allocation9], %s4768_s9, %s4768_s9, %s4767_s20  }
  0x6a   : > { %s30_s16 = ssub.s32 %s3636_s24, %s3807_s14  ;;  %s33_s8 = sadd.s32 1, %s3632_s23 }
  0x6b   : > { %p31_p4 = scmp.eq.s32.totalorder %s30_s16, 0  ;;  %p40_p8 = scmp.ne.s32.totalorder %s3632_s23, %s3628_s22 }
  0x6c   : > { %p41_p13 = scmp.eq.s32.totalorder %s3636_s24, 0  ;;  %p3290_p6 = scmp.lt.s32.totalorder %s3636_s24, 2 }
  0x6d   : > { %s3838_s11 = scalar_select %p31_p4, %s3632_s23, %s33_s8  }
  0x6e   : > { %p42_p10 = por %p41_p13, %p40_p8  ;;  %p4769_p3 = scmp.eq.s32.totalorder %s3712_s25, 1 }
  0x6f   : > { %s3847_s15 = sand.u32 1, %s3632_s23   ;;  %s2719_s13 = sshll.u32 %s3636_s24, 9 }
  0x70   : > { %p3842_p5 = por %p4769_p3, %p40_p8  ;;  %s2640_s17 = sshll.u32 %s3847_s15, 5 }
  0x71   : > { %s4771_s0 = sld [smem:[#allocation17_spill]]  ;;  %s252_s20 = scalar_lea.vmem [#allocation2], %s2640_s17 }
  0x72   : > { %s260_s9 = sshll.u32 %s252_s20, 4  ;;  %p3856_p11 = pnand %p3290_p6, %p42_p10  ;;  %s3860_s9 = int_to_ptr.vmem [resolvable:$true] %s260_s9 }
  0x73   : > { %s249_s16 = scalar_lea.sflag [#allocation3], %s3847_s15 }
  0x74   : > { %p3500_p9 = pneg %p3856_p11 }
  0x77   : > { %s3854_s10 = scalar_lea.hbm %s4771_s0, %s2719_s13  ;;  %s3503_s18 = scalar_lea.hbm %s4771_s0, 1024 }
  0x78   : > { %s3498_s8 = scalar_lea.hbm %s3854_s10, 512  ;;  %p3504_p1 = scmp.lt.u32.totalorder %s3854_s10, %s4771_s0 }
  0x79   : > { %p3499_p7 = scmp.ne.s32.totalorder %s3854_s10, %s3498_s8  ;;  %p3505_p2 = scmp.lt.u32.totalorder %s3503_s18, %s3498_s8 }
  0x7a   : > { %p3507_p8 = scmp.lt.u32.totalorder %s3498_s8, %s3854_s10 }
  0x7b   : > { %p3501_p12 = pnand %p3500_p9, %p3499_p7  ;;  %p3506_p4 = por %p3505_p2, %p3504_p1 }
  0x7d   : > { %p3502_p0 = pneg %p3501_p12  ;;  %p3508_p13 = por %p3507_p8, %p3506_p4 }
  0x7f   : > { %p3509_p6 = pnand %p3508_p13, %p3502_p0 }
  0x81   : > { %3512 = shalt.err (!%p3509_p6)
}
  0x82   : > { %s3513_s26 = scalar_lea.vmem %s3860_s9, 512  ;;  %s3645_s13 = smov [#allocation2]  }
  0x83   : > { %p3514_p10 = scmp.ne.s32.totalorder %s3860_s9, %s3513_s26  ;;  %s3518_s17 = sshll.u32 %s3645_s13, 4  ;;  %s3519_s17 = int_to_ptr.vmem [resolvable:$false] %s3518_s17 }
  0x84   : > { %s3520_s7 = scalar_lea.vmem %s3519_s17, 1024  ;;  %p3521_p12 = scmp.lt.s32.totalorder %s3860_s9, %s3519_s17 }
  0x85   : > { %p3516_p3 = pnand %p3514_p10, %p3500_p9  ;;  %p3522_p1 = scmp.lt.s32.totalorder %s3520_s7, %s3513_s26 }
  0x87   : > { %p3517_p7 = pneg %p3516_p3  ;;  %p3523_p2 = por %p3522_p1, %p3521_p12 }
  0x89   : > { %p3524_p4 = pnand %p3523_p2, %p3517_p7 }
  0x8b   : > { %3527 = shalt.err (!%p3524_p4)
}
  0x8c   : > { %3279 = dma.hbm_to_vmem [thread:$0]  (!%p3856_p11), %s3854_s10, 512, %s3860_s9, %s249_s16, %s3642_s19, %s3642_s19, %s3643_s30  }
  0x8d   : > { %s2644_s8 = sshll.u32 %s3847_s15, 8  ;;  %s2721_s18 = sshll.u32 %s3636_s24, 12 }
  0x8e   : > { %s3899_s13 = scalar_lea.hbm %s4744_s1, %s2721_s18  ;;  %s274_s17 = scalar_lea.vmem [#allocation5], %s2644_s8 }
  0x8f   : > { %s282_s7 = sshll.u32 %s274_s17, 4  ;;  %s4773_s0 = sand.u32 1, %s3636_s24   ;;  %s3901_s7 = int_to_ptr.vmem [resolvable:$true] %s282_s7 }
  0x90   : > { %s3905_s3 = scalar_lea.sflag [#allocation6], %s4773_s0  ;;  %s3528_s4 = scalar_lea.hbm %s3899_s13, 4096 }
  0x91   : > { %p3529_p0 = scmp.ne.s32.totalorder %s3899_s13, %s3528_s4  ;;  %s3533_s9 = scalar_lea.hbm %s4744_s1, 8192 }
  0x92   : > { %p3534_p6 = scmp.lt.u32.totalorder %s3899_s13, %s4744_s1  ;;  %p3535_p10 = scmp.lt.u32.totalorder %s3533_s9, %s3528_s4 }
  0x93   : > { %p3531_p8 = pnand %p3529_p0, %p3500_p9  ;;  %p3537_p7 = scmp.lt.u32.totalorder %s3528_s4, %s3899_s13 }
  0x94   : > { %p3536_p3 = por %p3535_p10, %p3534_p6 }
  0x95   : > { %p3532_p13 = pneg %p3531_p8 }
  0x96   : > { %p3538_p12 = por %p3537_p7, %p3536_p3 }
  0x98   : > { %p3539_p1 = pnand %p3538_p12, %p3532_p13 }
  0x9a   : > { %3542 = shalt.err (!%p3539_p1)
}
  0x9b   : > { %s3543_s0 = scalar_lea.vmem %s3901_s7, 4096  ;;  %s3646_s8 = smov [#allocation5]  }
  0x9c   : > { %p3544_p2 = scmp.ne.s32.totalorder %s3901_s7, %s3543_s0  ;;  %s3548_s26 = sshll.u32 %s3646_s8, 4  ;;  %s3549_s26 = int_to_ptr.vmem [resolvable:$false] %s3548_s26 }
  0x9d   : > { %s3550_s20 = scalar_lea.vmem %s3549_s26, 8192  ;;  %p3551_p8 = scmp.lt.s32.totalorder %s3901_s7, %s3549_s26 }
  0x9e   : > { %p3546_p4 = pnand %p3544_p2, %p3500_p9  ;;  %p3552_p6 = scmp.lt.s32.totalorder %s3550_s20, %s3543_s0 }
  0xa0   : > { %p3547_p0 = pneg %p3546_p4  ;;  %p3553_p10 = por %p3552_p6, %p3551_p8 }
  0xa2   : > { %p3554_p3 = pnand %p3553_p10, %p3547_p0 }
  0xa4   : > { %3557 = shalt.err (!%p3554_p3)
}
  0xa5   : > { %3282 = dma.hbm_to_vmem [thread:$0]  (!%p3856_p11), %s3899_s13, 4096, %s3901_s7, %s3905_s3, %s3642_s19, %s3642_s19, %s3643_s30  }
  0xa6   : > { %p4774_p9 = scmp.ne.s32.totalorder %s4761_s29, 0 }
  0xa7   : > { %s3937_s4 = sand.u32 (!%p4774_p9), 1, %s3628_s22   ;;  %p4775_p13 = scmp.ne.s32.totalorder (!%p4774_p9), %s4759_s27, 0 }
  0xa8   : > { %294 = sbr.rel (%p4774_p9) target bundleno = 4404 (0x1134), region = 44  ;;  %s2649_s17 = sshll.u32 (!%p4774_p9), %s3937_s4, 5 }
  0xa9   : > { %s297_s15 = scalar_lea.sflag (!%p4774_p9), [#allocation3], %s3937_s4  ;;  %s3943_s2 = scalar_lea.vmem (!%p4774_p9), [#allocation2], %s2649_s17 }
  0xaf   : > { %3603 = dma.done.wait (%p4775_p13), %s297_s15, 512  }
  0xb0   : > { %3605 = vsyncadd (%p4775_p13), %s297_s15, 4294966784  ;;  %s305_s3 = sand.u32 1, %s3712_s25   ;;  %s2650_s29 = sshll.u32 %s3937_s4, 8 }
  0xb1   : > { %s306_s19 = scalar_lea.sflag [#allocation6], %s305_s3  ;;  %s3951_s30 = scalar_lea.vmem [#allocation5], %s2650_s29 }
  0xb2   : > { %3607 = dma.done.wait (%p4775_p13), %s306_s19, 4096  }
  0xb3   : > { %3609 = vsyncadd (%p4775_p13), %s306_s19, 4294963200  ;;  %p4776_p11 = scmp.eq.s32.totalorder %s3712_s25, 0 }
  0xb5   : > { %3611 = dma.done.wait (%p4776_p11), [#allocation6], 1024   ;;  %p4777_p7 = pmov %p4776_p11 }
  0xb7   : > { %3613 = vsyncadd (%p4777_p7), [#allocation6], 4294966272  ;;  %p4778_p12 = pmov %p4777_p7 }
  0xb8   : > { %p4779_p1 = pmov %p4777_p7 }
  0xb9   : > { %3615 = dma.done.wait (%p4778_p12), [#allocation9], 3072  }
  0xba   : > { %3617 = vsyncadd (%p4779_p1), [#allocation9], 4294964224  ;;  %v3647_v0 = vmov 0   ;;  %v3342_v1 = vld [vmem:[#allocation8 + $0x4] ss:$8 sps:$4 sm:$0xff]   ;;  %v3368_v14 = vld [vmem:[#allocation7 + $0x10] sm:$0xff]  }
  0xbb   : > { %660 = vmatprep.mubr.bf16.mxu1 %v3647_v0  ;;  %v3344_v2 = vld [vmem:[#allocation8] ss:$8 sps:$4 sm:$0xff]   ;;  %628 = vmatprep.subr.bf16.mxu1 %v3342_v1  ;;  %v3345_v3 = vld [vmem:[#allocation8 + $0x14] ss:$8 sps:$4 sm:$0xff]   ;;  %v3347_v4 = vld [vmem:[#allocation8 + $0x10] ss:$8 sps:$4 sm:$0xff]  }
  0xbc   : > { %629 = vmatpush1.bf16.msra.mxu1 %v3344_v2  ;;  %v3348_v5 = vld [vmem:[#allocation8 + $0x24] ss:$8 sps:$4 sm:$0xff]   ;;  %v3350_v6 = vld [vmem:[#allocation8 + $0x20] ss:$8 sps:$4 sm:$0xff]   ;;  %v3351_v7 = vld [vmem:[#allocation8 + $0x34] ss:$8 sps:$4 sm:$0xff]  }
  0xbd   : > { %630 = vmatprep.subr.bf16.mxu1 %v3345_v3  ;;  %v3353_v8 = vld [vmem:[#allocation8 + $0x30] ss:$8 sps:$4 sm:$0xff]   ;;  %v3354_v9 = vld [vmem:[#allocation8 + $0x44] ss:$8 sps:$4 sm:$0xff]   ;;  %v3356_v12 = vld [vmem:[#allocation8 + $0x40] ss:$8 sps:$4 sm:$0xff]  }
  0xbe   : > { %v3366_v10 = vld [vmem:[#allocation7] sm:$0xff]   ;;  %v3367_v11 = vld [vmem:[#allocation7 + $0x8] sm:$0xff]   ;;  %v3357_v13 = vld [vmem:[#allocation8 + $0x54] ss:$8 sps:$4 sm:$0xff]   ;;  %v3648_v55 = vmov 0.0   ;;  %vm3649_vm0 = vmmov 0  }
  0xbf   : > { %2888 = vmatprep.subr.bf16.mxu0 %v3366_v10  ;;  %v3359_v15 = vld [vmem:[#allocation8 + $0x50] ss:$8 sps:$4 sm:$0xff]   ;;  %v3360_v16 = vld [vmem:[#allocation8 + $0x64] ss:$8 sps:$4 sm:$0xff]   ;;  %v3362_v19 = vld [vmem:[#allocation8 + $0x60] ss:$8 sps:$4 sm:$0xff]  }
  0xc0   : > { %631 = vmatpush1.bf16.msra.mxu1 %v3347_v4  ;;  %2889 = vmatpush3.bf16.msra.mxu0 %v3366_v10  ;;  %v3369_v17 = vld [vmem:[#allocation7 + $0x18] sm:$0xff]   ;;  %v359_v18 = vld [vmem:[%s3943_s2] sm:$0xff]  ;;  %v360_v20 = vld [vmem:[%s3943_s2 + $0x8] sm:$0xff]  ;;  %vm856_vm1 = vcmask 261120   ;;  %s3650_s27 = smov 96   ;;  %s3651_s13 = smov 64  }
  0xc1   : > { %632 = vmatprep.subr.bf16.mxu1 %v3348_v5  ;;  %2890 = vmatprep.subr.bf16.mxu0 %v3367_v11  ;;  %v3363_v21 = vld [vmem:[#allocation8 + $0x74] ss:$8 sps:$4 sm:$0xff]   ;;  %v363_v22 = vpack.c.bf16 %v360_v20, %v359_v18  ;;  %v3365_v23 = vld [vmem:[#allocation8 + $0x70] ss:$8 sps:$4 sm:$0xff]   ;;  %v484_v24 = vld [vmem:[%s3951_s30] sm:$0xff]  ;;  %s3652_s7 = smov 32  }
  0xc2   : > { %v485_v25 = vld [vmem:[%s3951_s30 + $0x8] sm:$0xff]  ;;  %v3370_v26 = vld [vmem:[#allocation7 + $0x20] sm:$0xff]   ;;  %v3372_v29 = vld [vmem:[#allocation7 + $0x30] sm:$0xff]   ;;  %s354_s16 = scalar_lea.vmem [#allocation11], %s2649_s17  ;;  %s2723_s0 = sshll.u32 %s3712_s25, 9 }
  0xc3   : > { %2904 = vmatprep.mubr.bf16.mxu0 %v363_v22  ;;  %v3371_v27 = vld [vmem:[#allocation7 + $0x28] sm:$0xff]   ;;  %v516_v28 = vpack.c.bf16 %v485_v25, %v484_v24  ;;  %v486_v30 = vld [vmem:[%s3951_s30 + $0x10] sm:$0xff]  ;;  %v487_v31 = vld [vmem:[%s3951_s30 + $0x18] sm:$0xff]  ;;  %s2510_s18 = sshll.u32 %s354_s16, 4  ;;  %s4699_s20 = scalar_lea.hbm %s4749_s6, %s2723_s0  ;;  %s4694_s18 = int_to_ptr.vmem [resolvable:$true] %s2510_s18 }
  0xc4   : > { %633 = vmatpush1.bf16.msra.mxu1 %v3350_v6  ;;  %2891 = vmatpush3.bf16.msra.mxu0 %v3367_v11  ;;  %v3373_v32 = vld [vmem:[#allocation7 + $0x38] sm:$0xff]   ;;  %v517_v33 = vpack.c.bf16 %v487_v31, %v486_v30  ;;  %v361_v34 = vld [vmem:[%s3943_s2 + $0x10] sm:$0xff]  ;;  %v488_v36 = vld [vmem:[%s3951_s30 + $0x20] sm:$0xff]  ;;  %s2496_s25 = scalar_lea.sflag [#allocation4], %s3937_s4  ;;  %s3558_s17 = scalar_lea.vmem %s4694_s18, 512 }
  0xc5   : > { %634 = vmatprep.subr.bf16.mxu1 %v3351_v7  ;;  %2892 = vmatprep.subr.bf16.mxu0 %v3368_v14  ;;  %v362_v35 = vld [vmem:[%s3943_s2 + $0x18] sm:$0xff]  ;;  %v489_v37 = vld [vmem:[%s3951_s30 + $0x28] sm:$0xff]  ;;  %v490_v40 = vld [vmem:[%s3951_s30 + $0x30] sm:$0xff]  ;;  %p3559_p2 = scmp.ne.s32.totalorder %s4694_s18, %s3558_s17  ;;  %s3653_s15 = smov [#allocation11]  }
  0xc6   : > { %v364_v38 = vpack.c.bf16 %v362_v35, %v361_v34  ;;  %v518_v39 = vpack.c.bf16 %v489_v37, %v488_v36  ;;  %v491_v41 = vld [vmem:[%s3951_s30 + $0x38] sm:$0xff]  ;;  %v492_v43 = vld [vmem:[%s3951_s30 + $0x40] sm:$0xff]  ;;  %v493_v44 = vld [vmem:[%s3951_s30 + $0x48] sm:$0xff]  ;;  %s3562_s2 = sshll.u32 %s3653_s15, 4  ;;  %s3563_s2 = int_to_ptr.vmem [resolvable:$false] %s3562_s2 }
  0xc7   : > { %v519_v42 = vpack.c.bf16 %v491_v41, %v490_v40  ;;  %v520_v45 = vpack.c.bf16 %v493_v44, %v492_v43  ;;  %v494_v46 = vld [vmem:[%s3951_s30 + $0x50] sm:$0xff]  ;;  %v495_v47 = vld [vmem:[%s3951_s30 + $0x58] sm:$0xff]  ;;  %v496_v49 = vld [vmem:[%s3951_s30 + $0x60] sm:$0xff]  ;;  %p3560_p4 = pnand %p3559_p2, %p3842_p5  ;;  %s3564_s3 = scalar_lea.vmem %s3563_s2, 1024 }
  0xc8   : > { %635 = vmatpush1.bf16.msra.mxu1 %v3353_v8  ;;  %2893 = vmatpush3.bf16.msra.mxu0 %v3368_v14  ;;  %v521_v48 = vpack.c.bf16 %v495_v47, %v494_v46  ;;  %v497_v50 = vld [vmem:[%s3951_s30 + $0x68] sm:$0xff]  ;;  %v498_v52 = vld [vmem:[%s3951_s30 + $0x70] sm:$0xff]  ;;  %v499_v53 = vld [vmem:[%s3951_s30 + $0x78] sm:$0xff]  ;;  %p3565_p8 = scmp.lt.s32.totalorder %s4694_s18, %s3563_s2  ;;  %p3566_p6 = scmp.lt.s32.totalorder %s3564_s3, %s3558_s17 }
  0xc9   : > { %636 = vmatprep.subr.bf16.mxu1 %v3354_v9  ;;  %2894 = vmatprep.subr.bf16.mxu0 %v3369_v17  ;;  %v522_v51 = vpack.c.bf16 %v497_v50, %v496_v49  ;;  %v523_v54 = vpack.c.bf16 %v499_v53, %v498_v52  ;;  %v500_v56 = vld [vmem:[%s3951_s30 + $0x80] sm:$0xff]  ;;  %v501_v57 = vld [vmem:[%s3951_s30 + $0x88] sm:$0xff]  ;;  %v502_v59 = vld [vmem:[%s3951_s30 + $0x90] sm:$0xff]  ;;  %p3561_p0 = pneg %p3560_p4 }
  0xca   : > { %v524_v58 = vpack.c.bf16 %v501_v57, %v500_v56  ;;  %v503_v60 = vld [vmem:[%s3951_s30 + $0x98] sm:$0xff]  ;;  %v504_v2 = vld [vmem:[%s3951_s30 + $0xa0] sm:$0xff]  ;;  %v505_v3 = vld [vmem:[%s3951_s30 + $0xa8] sm:$0xff]  ;;  %p3567_p10 = por %p3566_p6, %p3565_p8 }
  0xcb   : > { %v525_v61 = vpack.c.bf16 %v503_v60, %v502_v59  ;;  %v526_v6 = vpack.c.bf16 %v505_v3, %v504_v2  ;;  %v508_v31 = vld [vmem:[%s3951_s30 + $0xc0] sm:$0xff]  ;;  %v511_v43 = vld [vmem:[%s3951_s30 + $0xd8] sm:$0xff]  ;;  %v513_v53 = vld [vmem:[%s3951_s30 + $0xe8] sm:$0xff] }
  0xcc   : > { %637 = vmatpush1.bf16.msra.mxu1 %v3356_v12  ;;  %2895 = vmatpush3.bf16.msra.mxu0 %v3369_v17  ;;  %v506_v12 = vld [vmem:[%s3951_s30 + $0xb0] sm:$0xff]  ;;  %v512_v52 = vld [vmem:[%s3951_s30 + $0xe0] sm:$0xff]  ;;  %p3568_p3 = pnand %p3567_p10, %p3561_p0 }
  0xcd   : > { %638 = vmatprep.subr.bf16.mxu1 %v3357_v13  ;;  %2896 = vmatprep.subr.bf16.mxu0 %v3370_v26  ;;  %v507_v13 = vld [vmem:[%s3951_s30 + $0xb8] sm:$0xff]  ;;  %v530_v57 = vpack.c.bf16 %v513_v53, %v512_v52 }
  0xd0   : > { %639 = vmatpush1.bf16.msra.mxu1 %v3359_v15  ;;  %2897 = vmatpush3.bf16.msra.mxu0 %v3370_v26 }
  0xd1   : > { %640 = vmatprep.subr.bf16.mxu1 %v3360_v16  ;;  %2898 = vmatprep.subr.bf16.mxu0 %v3371_v27  ;;  %v527_v16 = vpack.c.bf16 %v507_v13, %v506_v12 }
  0xd4   : > { %641 = vmatpush1.bf16.msra.mxu1 %v3362_v19  ;;  %2899 = vmatpush3.bf16.msra.mxu0 %v3371_v27 }
  0xd5   : > { %642 = vmatprep.subr.bf16.mxu1 %v3363_v21  ;;  %2900 = vmatprep.subr.bf16.mxu0 %v3372_v29 }
  0xd8   : > { %643 = vmatpush1.bf16.msra.mxu1 %v3365_v23  ;;  %2901 = vmatpush3.bf16.msra.mxu0 %v3372_v29 }
  0xd9   : > { %2902 = vmatprep.subr.bf16.mxu0 %v3373_v32  ;;  %2948 = vmatprep.subr.bf16.mxu1 %v3648_v55 }
  0xdb   : > { %661 = vmatmul.mubr.bf16.vlgmr.msra.gmra.mrb[0].mxu1 %v516_v28 }
  0xdc   : > { %670 = vmatprep.mubr.bf16.mxu1 %v3647_v0  ;;  %2903 = vmatpush3.bf16.msra.mxu0 %v3373_v32  ;;  %v509_v32 = vld [vmem:[%s3951_s30 + $0xc8] sm:$0xff] }
  0xdd   : > { %2908 = vmatprep.subr.bf16.mxu0 %v3648_v55  ;;  %v528_v36 = vpack.c.bf16 %v509_v32, %v508_v31 }
  0xdf   : > { %2905 = vmatmul.mubr.bf16.vlgmr.msra.gmra.mrb[0].mxu0 %v364_v38 }
  0xe0   : > { %2924 = vmatprep.mubr.msk.bf16.mxu0 %vm3649_vm0, %v3648_v55 }
  0xe3   : > { %671 = vmatmul.mubr.bf16.gmra.mrb[4].mxu1 %v517_v33 }
  0xe4   : > { %680 = vmatprep.mubr.bf16.mxu1 %v3647_v0 }
  0xeb   : > { %681 = vmatmul.mubr.bf16.gmra.mrb[8].mxu1 %v518_v39 }
  0xec   : > { %690 = vmatprep.mubr.bf16.mxu1 %v3647_v0 }
  0xf3   : > { %691 = vmatmul.mubr.bf16.gmra.mrb[12].mxu1 %v519_v42  ;;  %v510_v42 = vld [vmem:[%s3951_s30 + $0xd0] sm:$0xff] }
  0xf4   : > { %700 = vmatprep.mubr.bf16.mxu1 %v3647_v0  ;;  %v529_v46 = vpack.c.bf16 %v511_v43, %v510_v42 }
  0xfb   : > { %701 = vmatmul.mubr.bf16.gmra.mrb[16].mxu1 %v520_v45 }
  0xfc   : > { %710 = vmatprep.mubr.bf16.mxu1 %v3647_v0 }
 0x103   : > { %711 = vmatmul.mubr.bf16.gmra.mrb[20].mxu1 %v521_v48 }
 0x104   : > { %720 = vmatprep.mubr.bf16.mxu1 %v3647_v0 }
 0x10b   : > { %721 = vmatmul.mubr.bf16.gmra.mrb[24].mxu1 %v522_v51 }
 0x10c   : > { %730 = vmatprep.mubr.bf16.mxu1 %v3647_v0 }
 0x113   : > { %731 = vmatmul.mubr.bf16.gmra.mrb[28].mxu1 %v523_v54 }
 0x114   : > { %740 = vmatprep.mubr.bf16.mxu1 %v3647_v0 }
 0x11b   : > { %741 = vmatmul.mubr.bf16.gmra.mrb[32].mxu1 %v524_v58 }
 0x11c   : > { %750 = vmatprep.mubr.bf16.mxu1 %v3647_v0 }
 0x123   : > { %751 = vmatmul.mubr.bf16.gmra.mrb[36].mxu1 %v525_v61 }
 0x124   : > { %760 = vmatprep.mubr.bf16.mxu1 %v3647_v0 }
 0x12b   : > { %761 = vmatmul.mubr.bf16.gmra.mrb[40].mxu1 %v526_v6 }
 0x12c   : > { %770 = vmatprep.mubr.bf16.mxu1 %v3647_v0 }
 0x133   : > { %771 = vmatmul.mubr.bf16.gmra.mrb[44].mxu1 %v527_v16 }
 0x134   : > { %780 = vmatprep.mubr.bf16.mxu1 %v3647_v0 }
 0x13b   : > { %781 = vmatmul.mubr.bf16.gmra.mrb[48].mxu1 %v528_v36 }
 0x13c   : > { %790 = vmatprep.mubr.bf16.mxu1 %v3647_v0 }
 0x143   : > { %791 = vmatmul.mubr.bf16.gmra.mrb[52].mxu1 %v529_v46 }
 0x144   : > { %800 = vmatprep.mubr.bf16.mxu1 %v3647_v0 }
 0x14b   : > { %801 = vmatmul.mubr.bf16.gmra.mrb[56].mxu1 %v530_v57 }
 0x14c   : > { %810 = vmatprep.mubr.bf16.mxu1 %v3647_v0 }
 0x1ae   : > { %v662_v62 = vpop.f32.mrb[0].mxu1 }
 0x1af   : > { %v664_v63 = vpop.f32.mrb[1].mxu1 }
 0x1b0   : > { %v666_v1 = vpop.f32.mrb[2].mxu1 }
 0x1b1   : > { %v4006_v4 = vpack.c.bf16 %v666_v1, %v662_v62  ;;  %v668_v5 = vpop.f32.mrb[3].mxu1  ;;  %v515_v1 = vld [vmem:[%s3951_s30 + $0xf8] sm:$0xff] }
 0x1b2   : > { %v4008_v7 = vpack.c.bf16 %v668_v5, %v664_v63  ;;  %v2906_v19 = vpop.f32.mrb[0].mxu0  ;;  %v514_v63 = vld [vmem:[%s3951_s30 + $0xf0] sm:$0xff] }
 0x1b3   : > { %1017 = vrot.lane.b32.xlu0 %v4006_v4, %s3650_s27  ;;  %v861_v8 = vsel %vm856_vm1, %v4006_v4, 0  ;;  %v480_v20 = vmul.f32 0.17677669, %v2906_v19  ;;  %v463_v21 = vpop.f32.mrb[1].mxu0  ;;  %v531_v5 = vpack.c.bf16 %v515_v1, %v514_v63 }
 0x1b4   : > { %2909 = vmatpush3.bf16.xpose.msra.mxu0 %v861_v8  ;;  %v478_v22 = vmul.f32 0.17677669, %v463_v21  ;;  %v2907_v23 = vpop.f32.mrb[2].mxu0 }
 0x1b5   : > { %2910 = vmatprep.subr.bf16.mxu0 %v3648_v55  ;;  %v481_v25 = vmul.f32 0.17677669, %v2907_v23  ;;  %v466_v26 = vpop.f32.mrb[3].mxu0  ;;  %811 = vmatmul.mubr.bf16.gmra.mrb[60].mxu1 %v531_v5 }
 0x1b6   : > { %v672_v9 = vpop.f32.mrb[4].mxu1  ;;  %v479_v28 = vmul.f32 0.17677669, %v466_v26  ;;  %2964 = vmatprep.mubr.msk.bf16.mxu1 %vm3649_vm0, %v3648_v55 }
 0x1b7   : > { %v674_v10 = vpop.f32.mrb[5].mxu1  ;;  %v4028_v30 = vpack.c.bf16 %v481_v25, %v480_v20 }
 0x1b8   : > { %v676_v11 = vpop.f32.mrb[6].mxu1  ;;  %v4034_v35 = vpack.c.bf16 %v479_v28, %v478_v22 }
 0x1b9   : > { %v4018_v14 = vpack.c.bf16 %v676_v11, %v672_v9  ;;  %v678_v15 = vpop.f32.mrb[7].mxu1 }
 0x1ba   : > { %v4020_v17 = vpack.c.bf16 %v678_v15, %v674_v10 }
 0x1bb   : > { %1019 = vrot.lane.b32.xlu0 %v4018_v14, %s3650_s27  ;;  %v864_v18 = vsel %vm856_vm1, %v4018_v14, 0 }
 0x1bc   : > { %2911 = vmatpush3.bf16.xpose.msra.mxu0 %v864_v18 }
 0x1bd   : > { %2912 = vmatprep.subr.bf16.mxu0 %v3648_v55 }
 0x1be   : > { %v682_v24 = vpop.f32.mrb[8].mxu1 }
 0x1bf   : > { %v684_v27 = vpop.f32.mrb[9].mxu1 }
 0x1c0   : > { %v686_v29 = vpop.f32.mrb[10].mxu1 }
 0x1c1   : > { %v4032_v33 = vpack.c.bf16 %v686_v29, %v682_v24  ;;  %v688_v34 = vpop.f32.mrb[11].mxu1 }
 0x1c2   : > { %v4036_v37 = vpack.c.bf16 %v688_v34, %v684_v27 }
 0x1c3   : > { %1021 = vrot.lane.b32.xlu1 %v4032_v33, %s3650_s27  ;;  %v867_v38 = vsel %vm856_vm1, %v4032_v33, 0 }
 0x1c4   : > { %2913 = vmatpush3.bf16.xpose.msra.mxu0 %v867_v38 }
 0x1c5   : > { %2914 = vmatprep.subr.bf16.mxu0 %v3648_v55 }
 0x1c6   : > { %v692_v39 = vpop.f32.mrb[12].mxu1 }
 0x1c7   : > { %v694_v40 = vpop.f32.mrb[13].mxu1 }
 0x1c8   : > { %v696_v41 = vpop.f32.mrb[14].mxu1 }
 0x1c9   : > { %v4046_v44 = vpack.c.bf16 %v696_v41, %v692_v39  ;;  %v698_v45 = vpop.f32.mrb[15].mxu1 }
 0x1ca   : > { %v4048_v47 = vpack.c.bf16 %v698_v45, %v694_v40 }
 0x1cb   : > { %1023 = vrot.lane.b32.xlu1 %v4046_v44, %s3650_s27  ;;  %v870_v48 = vsel %vm856_vm1, %v4046_v44, 0 }
 0x1cc   : > { %2915 = vmatpush3.bf16.xpose.msra.mxu0 %v870_v48 }
 0x1cd   : > { %2916 = vmatprep.subr.bf16.mxu0 %v3648_v55 }
 0x1ce   : > { %v702_v49 = vpop.f32.mrb[16].mxu1 }
 0x1cf   : > { %v704_v50 = vpop.f32.mrb[17].mxu1 }
 0x1d0   : > { %v706_v51 = vpop.f32.mrb[18].mxu1 }
 0x1d1   : > { %v4058_v54 = vpack.c.bf16 %v706_v51, %v702_v49  ;;  %v708_v56 = vpop.f32.mrb[19].mxu1 }
 0x1d2   : > { %v4060_v58 = vpack.c.bf16 %v708_v56, %v704_v50 }
 0x1d3   : > { %1025 = vrot.lane.b32.xlu0 %v4058_v54, %s3650_s27  ;;  %v873_v59 = vsel %vm856_vm1, %v4058_v54, 0 }
 0x1d4   : > { %2917 = vmatpush3.bf16.xpose.msra.mxu0 %v873_v59 }
 0x1d5   : > { %2918 = vmatprep.subr.bf16.mxu0 %v3648_v55 }
 0x1d6   : > { %v712_v60 = vpop.f32.mrb[20].mxu1 }
 0x1d7   : > { %v714_v61 = vpop.f32.mrb[21].mxu1 }
 0x1d8   : > { %v716_v62 = vpop.f32.mrb[22].mxu1 }
 0x1d9   : > { %v4070_v2 = vpack.c.bf16 %v716_v62, %v712_v60  ;;  %v718_v3 = vpop.f32.mrb[23].mxu1 }
 0x1da   : > { %v4072_v6 = vpack.c.bf16 %v718_v3, %v714_v61 }
 0x1db   : > { %1027 = vrot.lane.b32.xlu1 %v4070_v2, %s3650_s27  ;;  %v876_v8 = vsel %vm856_vm1, %v4070_v2, 0 }
 0x1dc   : > { %2919 = vmatpush3.bf16.xpose.msra.mxu0 %v876_v8 }
 0x1dd   : > { %2920 = vmatprep.subr.bf16.mxu0 %v3648_v55 }
 0x1de   : > { %v722_v0 = vpop.f32.mrb[24].mxu1 }
 0x1df   : > { %v724_v9 = vpop.f32.mrb[25].mxu1 }
 0x1e0   : > { %v726_v10 = vpop.f32.mrb[26].mxu1 }
 0x1e1   : > { %v4081_v11 = vpack.c.bf16 %v726_v10, %v722_v0  ;;  %v728_v12 = vpop.f32.mrb[27].mxu1 }
 0x1e2   : > { %v4083_v13 = vpack.c.bf16 %v728_v12, %v724_v9 }
 0x1e3   : > { %1029 = vrot.lane.b32.xlu0 %v4081_v11, %s3650_s27  ;;  %v879_v15 = vsel %vm856_vm1, %v4081_v11, 0 }
 0x1e4   : > { %2921 = vmatpush3.bf16.xpose.msra.mxu0 %v879_v15 }
 0x1e5   : > { %2922 = vmatprep.subr.bf16.mxu0 %v3648_v55 }
 0x1e6   : > { %v732_v16 = vpop.f32.mrb[28].mxu1 }
 0x1e7   : > { %v734_v18 = vpop.f32.mrb[29].mxu1  ;;  %1007 = vrot.lane.b32.xlu0 %v4034_v35, %s3650_s27 }
 0x1e8   : > { %v736_v19 = vpop.f32.mrb[30].mxu1 }
 0x1e9   : > { %v4092_v20 = vpack.c.bf16 %v736_v19, %v732_v16  ;;  %v738_v21 = vpop.f32.mrb[31].mxu1 }
 0x1ea   : > { %v4094_v22 = vpack.c.bf16 %v738_v21, %v734_v18 }
 0x1eb   : > { %1031 = vrot.lane.b32.xlu1 %v4092_v20, %s3650_s27  ;;  %1148 = vrot.lane.b32.xlu0 %v4008_v7, %s3650_s27  ;;  %v882_v23 = vsel %vm856_vm1, %v4092_v20, 0 }
 0x1ec   : > { %2923 = vmatpush3.bf16.xpose.msra.mxu0 %v882_v23 }
 0x1ed   : > { %2928 = vmatprep.subr.bf16.mxu0 %v3648_v55 }
 0x1ee   : > { %v742_v46 = vpop.f32.mrb[32].mxu1 }
 0x1ef   : > { %1150 = vrot.lane.b32.xlu1 %v4020_v17, %s3650_s27  ;;  %1152 = vrot.lane.b32.xlu0 %v4036_v37, %s3650_s27  ;;  %v744_v48 = vpop.f32.mrb[33].mxu1 }
 0x1f0   : > { %v746_v49 = vpop.f32.mrb[34].mxu1 }
 0x1f1   : > { %v748_v50 = vpop.f32.mrb[35].mxu1  ;;  %v4150_v51 = vpack.c.bf16 %v746_v49, %v742_v46 }
 0x1f2   : > { %v4152_v52 = vpack.c.bf16 %v748_v50, %v744_v48 }
 0x1f3   : > { %1154 = vrot.lane.b32.xlu1 %v4048_v47, %s3650_s27  ;;  %2925 = vmatmul.mubr.msk.bf16.vlgmr.msra.gmra.mrb[4].mxu0 %vm856_vm1, %v4034_v35 }
 0x1f4   : > { %2929 = vmatpush3.bf16.msra.mxu0 %v4008_v7  ;;  %2944 = vmatprep.mubr.msk.bf16.mxu0 %vm3649_vm0, %v3648_v55 }
 0x1f5   : > { %2930 = vmatprep.subr.bf16.mxu0 %v3648_v55 }
 0x1f6   : > { %v752_v53 = vpop.f32.mrb[36].mxu1 }
 0x1f7   : > { %1156 = vrot.lane.b32.xlu1 %v4060_v58, %s3650_s27  ;;  %v754_v56 = vpop.f32.mrb[37].mxu1 }
 0x1f8   : > { %2931 = vmatpush3.bf16.msra.mxu0 %v4020_v17  ;;  %v756_v57 = vpop.f32.mrb[38].mxu1 }
 0x1f9   : > { %2932 = vmatprep.subr.bf16.mxu0 %v3648_v55  ;;  %v4154_v59 = vpack.c.bf16 %v756_v57, %v752_v53  ;;  %v758_v60 = vpop.f32.mrb[39].mxu1 }
 0x1fa   : > { %v4156_v61 = vpack.c.bf16 %v758_v60, %v754_v56 }
 0x1fc   : > { %2933 = vmatpush3.bf16.msra.mxu0 %v4036_v37 }
 0x1fd   : > { %2934 = vmatprep.subr.bf16.mxu0 %v3648_v55 }
 0x1fe   : > { %v762_v62 = vpop.f32.mrb[40].mxu1 }
 0x1ff   : > { %v764_v63 = vpop.f32.mrb[41].mxu1 }
 0x200   : > { %2935 = vmatpush3.bf16.msra.mxu0 %v4048_v47  ;;  %v766_v1 = vpop.f32.mrb[42].mxu1 }
 0x201   : > { %2936 = vmatprep.subr.bf16.mxu0 %v3648_v55  ;;  %v4158_v3 = vpack.c.bf16 %v766_v1, %v762_v62  ;;  %v768_v5 = vpop.f32.mrb[43].mxu1 }
 0x202   : > { %v4160_v8 = vpack.c.bf16 %v768_v5, %v764_v63  ;;  %v853_v63 = vlaneseq }
 0x204   : > { %2937 = vmatpush3.bf16.msra.mxu0 %v4060_v58 }
 0x205   : > { %2938 = vmatprep.subr.bf16.mxu0 %v3648_v55 }
 0x206   : > { %v772_v0 = vpop.f32.mrb[44].mxu1 }
 0x207   : > { %v774_v9 = vpop.f32.mrb[45].mxu1 }
 0x208   : > { %2939 = vmatpush3.bf16.msra.mxu0 %v4072_v6  ;;  %v776_v10 = vpop.f32.mrb[46].mxu1 }
 0x209   : > { %2940 = vmatprep.subr.bf16.mxu0 %v3648_v55  ;;  %v4162_v12 = vpack.c.bf16 %v776_v10, %v772_v0  ;;  %v778_v15 = vpop.f32.mrb[47].mxu1  ;;  %v4182_v0 = vshrl.u32 %v853_v63, 7 }
 0x20a   : > { %v4164_v16 = vpack.c.bf16 %v778_v15, %v774_v9 }
 0x20b   : > { %v4185_v15 = vadd.s32 8, %v4182_v0 }
 0x20c   : > { %2941 = vmatpush3.bf16.msra.mxu0 %v4083_v13 }
 0x20d   : > { %2942 = vmatprep.subr.bf16.mxu0 %v3648_v55 }
 0x20e   : > { %v782_v18 = vpop.f32.mrb[48].mxu1 }
 0x20f   : > { %v784_v19 = vpop.f32.mrb[49].mxu1 }
 0x210   : > { %2943 = vmatpush3.bf16.msra.mxu0 %v4094_v22  ;;  %v786_v21 = vpop.f32.mrb[50].mxu1 }
 0x211   : > { %2968 = vmatprep.subr.bf16.mxu0 %v3648_v55  ;;  %v4166_v23 = vpack.c.bf16 %v786_v21, %v782_v18 }
 0x225   : > { %v1018_v24 = vpop.permute.xlu0 %1017 }
 0x226   : > { %v1037_v25 = vsel %vm856_vm1, %v1018_v24, 0  ;;  %v788_v24 = vpop.f32.mrb[51].mxu1 }
 0x227   : > { %2949 = vmatpush3.bf16.xpose.msra.mxu1 %v1037_v25  ;;  %v4168_v25 = vpack.c.bf16 %v788_v24, %v784_v19 }
 0x228   : > { %2950 = vmatprep.subr.bf16.mxu1 %v3648_v55 }
 0x22d   : > { %v1020_v26 = vpop.permute.xlu0 %1019 }
 0x22e   : > { %v1040_v27 = vsel %vm856_vm1, %v1020_v26, 0  ;;  %v792_v26 = vpop.f32.mrb[52].mxu1 }
 0x22f   : > { %2951 = vmatpush3.bf16.xpose.msra.mxu1 %v1040_v27  ;;  %v794_v27 = vpop.f32.mrb[53].mxu1 }
 0x230   : > { %2952 = vmatprep.subr.bf16.mxu1 %v3648_v55 }
 0x235   : > { %v1022_v28 = vpop.permute.xlu1 %1021 }
 0x236   : > { %v1043_v29 = vsel %vm856_vm1, %v1022_v28, 0  ;;  %v796_v28 = vpop.f32.mrb[54].mxu1 }
 0x237   : > { %2953 = vmatpush3.bf16.xpose.msra.mxu1 %v1043_v29  ;;  %v4170_v29 = vpack.c.bf16 %v796_v28, %v792_v26 }
 0x238   : > { %2954 = vmatprep.subr.bf16.mxu1 %v3648_v55 }
 0x23d   : > { %v1024_v31 = vpop.permute.xlu1 %1023 }
 0x23e   : > { %v1046_v32 = vsel %vm856_vm1, %v1024_v31, 0  ;;  %v798_v31 = vpop.f32.mrb[55].mxu1 }
 0x23f   : > { %2955 = vmatpush3.bf16.xpose.msra.mxu1 %v1046_v32  ;;  %v4172_v32 = vpack.c.bf16 %v798_v31, %v794_v27 }
 0x240   : > { %2956 = vmatprep.subr.bf16.mxu1 %v3648_v55 }
 0x245   : > { %v1026_v34 = vpop.permute.xlu0 %1025 }
 0x246   : > { %v1049_v36 = vsel %vm856_vm1, %v1026_v34, 0  ;;  %v802_v34 = vpop.f32.mrb[56].mxu1 }
 0x247   : > { %2957 = vmatpush3.bf16.xpose.msra.mxu1 %v1049_v36  ;;  %v804_v36 = vpop.f32.mrb[57].mxu1 }
 0x248   : > { %2958 = vmatprep.subr.bf16.mxu1 %v3648_v55 }
 0x24d   : > { %v1028_v38 = vpop.permute.xlu1 %1027 }
 0x24e   : > { %v1052_v39 = vsel %vm856_vm1, %v1028_v38, 0  ;;  %v806_v38 = vpop.f32.mrb[58].mxu1 }
 0x24f   : > { %2959 = vmatpush3.bf16.xpose.msra.mxu1 %v1052_v39  ;;  %v4174_v39 = vpack.c.bf16 %v806_v38, %v802_v34 }
 0x250   : > { %2960 = vmatprep.subr.bf16.mxu1 %v3648_v55 }
 0x255   : > { %v1030_v40 = vpop.permute.xlu0 %1029 }
 0x256   : > { %v1055_v41 = vsel %vm856_vm1, %v1030_v40, 0  ;;  %v808_v40 = vpop.f32.mrb[59].mxu1 }
 0x257   : > { %2961 = vmatpush3.bf16.xpose.msra.mxu1 %v1055_v41  ;;  %v4176_v41 = vpack.c.bf16 %v808_v40, %v804_v36 }
 0x258   : > { %2962 = vmatprep.subr.bf16.mxu1 %v3648_v55 }
 0x259   : > { %v1008_v45 = vpop.permute.xlu0 %1007 }
 0x25d   : > { %v1032_v42 = vpop.permute.xlu1 %1031 }
 0x25e   : > { %v1058_v43 = vsel %vm856_vm1, %v1032_v42, 0 }
 0x25f   : > { %2963 = vmatpush3.bf16.xpose.msra.mxu1 %v1058_v43 }
 0x260   : > { %3008 = vmatprep.subr.bf16.mxu1 %v3648_v55 }
 0x266   : > { %2965 = vmatmul.mubr.msk.bf16.vlgmr.msra.gmra.mrb[64].mxu1 %vm856_vm1, %v1008_v45 }
 0x267   : > { %3024 = vmatprep.mubr.msk.bf16.mxu1 %vm3649_vm0, %v3648_v55 }
 0x288   : > { %v812_v42 = vpop.f32.mrb[60].mxu1 }
 0x289   : > { %v814_v43 = vpop.f32.mrb[61].mxu1 }
 0x28a   : > { %v816_v45 = vpop.f32.mrb[62].mxu1 }
 0x28b   : > { %v4178_v46 = vpack.c.bf16 %v816_v45, %v812_v42  ;;  %v818_v48 = vpop.f32.mrb[63].mxu1 }
 0x28c   : > { %v4180_v49 = vpack.c.bf16 %v818_v48, %v814_v43 }
 0x2c6   : > { %v918_v50 = vpop.f32.mrb[4].mxu0 }
 0x2c7   : > { %v2926_v53 = vpop.f32.mrb[5].mxu0 }
 0x2c8   : > { %v921_v56 = vpop.f32.mrb[6].mxu0 }
 0x2c9   : > { %v925_v57 = vmax.f32 %v918_v50, %v921_v56  ;;  %v2927_v60 = vpop.f32.mrb[7].mxu0 }
 0x2cb   : > { %v926_v62 = vrot.slane %v925_v57, 4 }
 0x2cd   : > { %v927_v1 = vmax.f32 %v925_v57, %v926_v62 }
 0x2cf   : > { %v928_v5 = vrot.slane %v927_v1, 2 }
 0x2d1   : > { %v929_v9 = vmax.f32 %v927_v1, %v928_v5 }
 0x2d3   : > { %v930_v10 = vrot.slane %v929_v9, 1 }
 0x2d5   : > { %v931_v18 = vmax.f32 %v929_v9, %v930_v10 }
 0x2d7   : > { %vm932_vm2 = vcmp.eq.f32.partialorder %v918_v50, %v931_v18  ;;  %vm933_vm3 = vcmp.eq.f32.partialorder %v921_v56, %v931_v18 }
 0x2d8   : > { %v934_v19 = vsel %vm932_vm2, %v4182_v0, 16  ;;  %v935_v21 = vsel %vm933_vm3, %v4185_v15, 16 }
 0x2d9   : > { %vm936_vm4 = vcmp.lt.s32.totalorder %v934_v19, %v935_v21 }
 0x2da   : > { %v937_v24 = vsel %vm936_vm4, %v934_v19, %v935_v21 }
 0x2db   : > { %v938_v26 = vrot.slane %v937_v24, 4 }
 0x2dd   : > { %vm939_vm5 = vcmp.lt.s32.totalorder %v937_v24, %v938_v26 }
 0x2de   : > { %v940_v27 = vsel %vm939_vm5, %v937_v24, %v938_v26 }
 0x2df   : > { %v941_v28 = vrot.slane %v940_v27, 2 }
 0x2e1   : > { %vm942_vm6 = vcmp.lt.s32.totalorder %v940_v27, %v941_v28 }
 0x2e2   : > { %v943_v31 = vsel %vm942_vm6, %v940_v27, %v941_v28 }
 0x2e3   : > { %v944_v34 = vrot.slane %v943_v31, 1 }
 0x2e5   : > { %vm945_vm7 = vcmp.lt.s32.totalorder %v943_v31, %v944_v34 }
 0x2e6   : > { %v946_v36 = vsel %vm945_vm7, %v943_v31, %v944_v34  ;;  %v1151_v31 = vpop.permute.xlu1 %1150  ;;  %v1149_v34 = vpop.permute.xlu0 %1148 }
 0x2e7   : > { %vm948_vm8 = vcmp.eq.s32.totalorder %v4185_v15, %v946_v36  ;;  %vm947_vm9 = vcmp.eq.s32.totalorder %v4182_v0, %v946_v36 }
 0x2e8   : > { %v4192_v38 = vsel %vm948_vm8, 1.0, %v3648_v55  ;;  %v4195_v40 = vsel %vm947_vm9, 1.0, %v3648_v55 }
 0x2e9   : > { %955 = vadd.xlane.f32.xlu0 %v4192_v38  ;;  %953 = vadd.xlane.f32.xlu1 %v4195_v40 }
 0x2ea   : > { %v1155_v36 = vpop.permute.xlu1 %1154 }
 0x2fa   : > { %1160 = vrot.lane.b32.xlu1 %v4083_v13, %s3650_s27 }
 0x2ff   : > { %1158 = vrot.lane.b32.xlu0 %v4072_v6, %s3650_s27 }
 0x339   : > { %v1094_v42 = vpop.f32.mrb[64].mxu1 }
 0x33a   : > { %v2966_v43 = vpop.f32.mrb[65].mxu1 }
 0x33b   : > { %v1097_v45 = vpop.f32.mrb[66].mxu1  ;;  %v1157_v43 = vpop.permute.xlu1 %1156 }
 0x33c   : > { %v1101_v48 = vmax.f32 %v1094_v42, %v1097_v45  ;;  %v2967_v50 = vpop.f32.mrb[67].mxu1 }
 0x33e   : > { %v1102_v53 = vrot.slane %v1101_v48, 4 }
 0x340   : > { %v1103_v56 = vmax.f32 %v1101_v48, %v1102_v53 }
 0x342   : > { %v1104_v57 = vrot.slane %v1103_v56, 2 }
 0x344   : > { %v1105_v60 = vmax.f32 %v1103_v56, %v1104_v57 }
 0x346   : > { %v1106_v62 = vrot.slane %v1105_v60, 1 }
 0x348   : > { %v1107_v63 = vmax.f32 %v1105_v60, %v1106_v62 }
 0x34a   : > { %vm1108_vm10 = vcmp.eq.f32.partialorder %v1094_v42, %v1107_v63  ;;  %vm1109_vm11 = vcmp.eq.f32.partialorder %v1097_v45, %v1107_v63  ;;  %v1153_v42 = vpop.permute.xlu0 %1152 }
 0x34b   : > { %v1110_v1 = vsel %vm1108_vm10, %v4182_v0, 16  ;;  %v1111_v5 = vsel %vm1109_vm11, %v4185_v15, 16 }
 0x34c   : > { %vm1112_vm12 = vcmp.lt.s32.totalorder %v1110_v1, %v1111_v5 }
 0x34d   : > { %v1113_v9 = vsel %vm1112_vm12, %v1110_v1, %v1111_v5 }
 0x34e   : > { %v1114_v10 = vrot.slane %v1113_v9, 4 }
 0x350   : > { %vm1115_vm13 = vcmp.lt.s32.totalorder %v1113_v9, %v1114_v10 }
 0x351   : > { %v1116_v18 = vsel %vm1115_vm13, %v1113_v9, %v1114_v10 }
 0x352   : > { %v1117_v19 = vrot.slane %v1116_v18, 2 }
 0x354   : > { %vm1118_vm14 = vcmp.lt.s32.totalorder %v1116_v18, %v1117_v19 }
 0x355   : > { %v1119_v21 = vsel %vm1118_vm14, %v1116_v18, %v1117_v19 }
 0x356   : > { %v1120_v24 = vrot.slane %v1119_v21, 1 }
 0x358   : > { %vm1121_vm15 = vcmp.lt.s32.totalorder %v1119_v21, %v1120_v24 }
 0x359   : > { %v1122_v26 = vsel %vm1121_vm15, %v1119_v21, %v1120_v24 }
 0x35a   : > { %vm1124_vm2 = vcmp.eq.s32.totalorder %v4185_v15, %v1122_v26  ;;  %vm1123_vm3 = vcmp.eq.s32.totalorder %v4182_v0, %v1122_v26 }
 0x35b   : > { %v4208_v27 = vsel %vm1124_vm2, 1.0, %v3648_v55  ;;  %v4211_v28 = vsel %vm1123_vm3, 1.0, %v3648_v55 }
 0x35c   : > { %1131 = vadd.xlane.f32.xlu0 %v4208_v27  ;;  %1129 = vadd.xlane.f32.xlu1 %v4211_v28 }
 0x36d   : > { %1216 = vrot.lane.b32.xlu1 %v4006_v4, %s3651_s13 }
 0x371   : > { %1220 = vrot.lane.b32.xlu1 %v4032_v33, %s3651_s13 }
 0x372   : > { %1162 = vrot.lane.b32.xlu0 %v4094_v22, %s3650_s27 }
 0x375   : > { %1224 = vrot.lane.b32.xlu1 %v4058_v54, %s3651_s13 }
 0x376   : > { %1218 = vrot.lane.b32.xlu0 %v4018_v14, %s3651_s13  ;;  %v956_v45 = vpop.xlane.xlu0 %955  ;;  %v954_v48 = vpop.xlane.xlu1 %953 }
 0x377   : > { %v958_v50 = vadd.f32 1.0, %v956_v45  ;;  %v957_v53 = vadd.f32 1.0, %v954_v48 }
 0x379   : > { %3382 = vrcp.f32 %v958_v50  ;;  %1228 = vrot.lane.b32.xlu1 %v4081_v11, %s3651_s13 }
 0x37a   : > { %3384 = vrcp.f32 %v957_v53  ;;  %1222 = vrot.lane.b32.xlu0 %v4046_v44, %s3651_s13 }
 0x37d   : > { %1214 = vrot.lane.b32.xlu1 %v4034_v35, %s3651_s13 }
 0x37e   : > { %1226 = vrot.lane.b32.xlu0 %v4070_v2, %s3651_s13 }
 0x381   : > { %1341 = vrot.lane.b32.xlu1 %v4020_v17, %s3651_s13 }
 0x382   : > { %1230 = vrot.lane.b32.xlu0 %v4092_v20, %s3651_s13 }
 0x383   : > { %v3383_v56 = vpop.eup %3382 }
 0x384   : > { %v3385_v57 = vpop.eup %3384  ;;  %v962_v60 = vmul.f32 %v3383_v56, %v4192_v38  ;;  %v1159_v38 = vpop.permute.xlu0 %1158 }
 0x385   : > { %1345 = vrot.lane.b32.xlu1 %v4048_v47, %s3651_s13  ;;  %v961_v62 = vmul.f32 %v3385_v57, %v4195_v40  ;;  %v1161_v40 = vpop.permute.xlu1 %1160 }
 0x386   : > { %1339 = vrot.lane.b32.xlu0 %v4008_v7, %s3651_s13 }
 0x387   : > { %v963_v63 = vpack.c.bf16 %v962_v60, %v961_v62 }
 0x389   : > { %2945 = vmatmul.mubr.bf16.vlgmr.msra.gmra.mrb[8].mxu0 %v963_v63  ;;  %1349 = vrot.lane.b32.xlu1 %v4072_v6, %s3651_s13 }
 0x38a   : > { %2969 = vmatpush3.bf16.msra.mxu0 %v1149_v34  ;;  %1343 = vrot.lane.b32.xlu0 %v4036_v37, %s3651_s13 }
 0x38b   : > { %2970 = vmatprep.subr.bf16.mxu0 %v3648_v55  ;;  %2984 = vmatprep.mubr.msk.bf16.mxu0 %vm3649_vm0, %v3648_v55 }
 0x38e   : > { %2971 = vmatpush3.bf16.msra.mxu0 %v1151_v31  ;;  %1347 = vrot.lane.b32.xlu0 %v4060_v58, %s3651_s13 }
 0x38f   : > { %2972 = vmatprep.subr.bf16.mxu0 %v3648_v55 }
 0x392   : > { %2973 = vmatpush3.bf16.msra.mxu0 %v1153_v42  ;;  %1351 = vrot.lane.b32.xlu0 %v4083_v13, %s3651_s13 }
 0x393   : > { %2974 = vmatprep.subr.bf16.mxu0 %v3648_v55 }
 0x396   : > { %2975 = vmatpush3.bf16.msra.mxu0 %v1155_v36 }
 0x397   : > { %2976 = vmatprep.subr.bf16.mxu0 %v3648_v55 }
 0x39a   : > { %2977 = vmatpush3.bf16.msra.mxu0 %v1157_v43 }
 0x39b   : > { %2978 = vmatprep.subr.bf16.mxu0 %v3648_v55 }
 0x39e   : > { %2979 = vmatpush3.bf16.msra.mxu0 %v1159_v38 }
 0x39f   : > { %2980 = vmatprep.subr.bf16.mxu0 %v3648_v55 }
 0x3a2   : > { %2981 = vmatpush3.bf16.msra.mxu0 %v1161_v40 }
 0x3a3   : > { %2982 = vmatprep.subr.bf16.mxu0 %v3648_v55 }
 0x3e9   : > { %v1132_v1 = vpop.xlane.xlu0 %1131  ;;  %v1130_v5 = vpop.xlane.xlu1 %1129 }
 0x3ea   : > { %v1134_v9 = vadd.f32 1.0, %v1132_v1  ;;  %v1133_v10 = vadd.f32 1.0, %v1130_v5 }
 0x3ec   : > { %3386 = vrcp.f32 %v1134_v9 }
 0x3ed   : > { %3388 = vrcp.f32 %v1133_v10  ;;  %v1163_v18 = vpop.permute.xlu0 %1162  ;;  %v1217_v19 = vpop.permute.xlu1 %1216 }
 0x3ee   : > { %2983 = vmatpush3.bf16.msra.mxu0 %v1163_v18  ;;  %v1236_v53 = vsel %vm856_vm1, %v1217_v19, 0 }
 0x3ef   : > { %2988 = vmatprep.subr.bf16.mxu0 %v3648_v55 }
 0x3f1   : > { %v1219_v21 = vpop.permute.xlu0 %1218  ;;  %v1221_v24 = vpop.permute.xlu1 %1220 }
 0x3f2   : > { %v1242_v63 = vsel %vm856_vm1, %v1221_v24, 0 }
 0x3f5   : > { %v1223_v26 = vpop.permute.xlu0 %1222  ;;  %v1225_v31 = vpop.permute.xlu1 %1224 }
 0x3f6   : > { %v3387_v34 = vpop.eup %3386  ;;  %v1245_v1 = vsel %vm856_vm1, %v1223_v26, 0  ;;  %v1248_v10 = vsel %vm856_vm1, %v1225_v31, 0 }
 0x3f7   : > { %v3389_v36 = vpop.eup %3388  ;;  %v1138_v42 = vmul.f32 %v3387_v34, %v4208_v27  ;;  %v1239_v27 = vsel %vm856_vm1, %v1219_v21, 0 }
 0x3f8   : > { %v1137_v43 = vmul.f32 %v3389_v36, %v4211_v28 }
 0x3f9   : > { %v1227_v45 = vpop.permute.xlu0 %1226  ;;  %v1229_v48 = vpop.permute.xlu1 %1228 }
 0x3fa   : > { %v1139_v50 = vpack.c.bf16 %v1138_v42, %v1137_v43  ;;  %v1251_v18 = vsel %vm856_vm1, %v1227_v45, 0  ;;  %v1254_v19 = vsel %vm856_vm1, %v1229_v48, 0 }
 0x3fc   : > { %2985 = vmatmul.mubr.bf16.vlgmr.msra.gmra.mrb[12].mxu0 %v1139_v50 }
 0x3fd   : > { %2989 = vmatpush3.bf16.xpose.msra.mxu0 %v1236_v53  ;;  %v1231_v56 = vpop.permute.xlu0 %1230  ;;  %3004 = vmatprep.mubr.msk.bf16.mxu0 %vm3649_vm0, %v3648_v55  ;;  %v1215_v57 = vpop.permute.xlu1 %1214 }
 0x3fe   : > { %2990 = vmatprep.subr.bf16.mxu0 %v3648_v55  ;;  %v1257_v21 = vsel %vm856_vm1, %v1231_v56, 0 }
 0x401   : > { %v1340_v60 = vpop.permute.xlu0 %1339  ;;  %v1342_v28 = vpop.permute.xlu1 %1341 }
 0x402   : > { %3009 = vmatpush3.bf16.msra.mxu1 %v1340_v60 }
 0x403   : > { %3010 = vmatprep.subr.bf16.mxu1 %v3648_v55 }
 0x405   : > { %2991 = vmatpush3.bf16.xpose.msra.mxu0 %v1239_v27  ;;  %v1344_v62 = vpop.permute.xlu0 %1343  ;;  %v1346_v38 = vpop.permute.xlu1 %1345 }
 0x406   : > { %3011 = vmatpush3.bf16.msra.mxu1 %v1342_v28  ;;  %2992 = vmatprep.subr.bf16.mxu0 %v3648_v55 }
 0x407   : > { %3012 = vmatprep.subr.bf16.mxu1 %v3648_v55 }
 0x409   : > { %v1348_v40 = vpop.permute.xlu0 %1347  ;;  %v1350_v5 = vpop.permute.xlu1 %1349 }
 0x40a   : > { %3013 = vmatpush3.bf16.msra.mxu1 %v1344_v62 }
 0x40b   : > { %3014 = vmatprep.subr.bf16.mxu1 %v3648_v55 }
 0x40d   : > { %2993 = vmatpush3.bf16.xpose.msra.mxu0 %v1242_v63  ;;  %v1352_v9 = vpop.permute.xlu0 %1351 }
 0x40e   : > { %3015 = vmatpush3.bf16.msra.mxu1 %v1346_v38  ;;  %2994 = vmatprep.subr.bf16.mxu0 %v3648_v55 }
 0x40f   : > { %3016 = vmatprep.subr.bf16.mxu1 %v3648_v55 }
 0x412   : > { %3017 = vmatpush3.bf16.msra.mxu1 %v1348_v40 }
 0x413   : > { %3018 = vmatprep.subr.bf16.mxu1 %v3648_v55 }
 0x415   : > { %2995 = vmatpush3.bf16.xpose.msra.mxu0 %v1245_v1 }
 0x416   : > { %3019 = vmatpush3.bf16.msra.mxu1 %v1350_v5  ;;  %2996 = vmatprep.subr.bf16.mxu0 %v3648_v55 }
 0x417   : > { %3020 = vmatprep.subr.bf16.mxu1 %v3648_v55 }
 0x41a   : > { %3021 = vmatpush3.bf16.msra.mxu1 %v1352_v9 }
 0x41b   : > { %3022 = vmatprep.subr.bf16.mxu1 %v3648_v55 }
 0x41d   : > { %2997 = vmatpush3.bf16.xpose.msra.mxu0 %v1248_v10 }
 0x41e   : > { %2998 = vmatprep.subr.bf16.mxu0 %v3648_v55 }
 0x425   : > { %2999 = vmatpush3.bf16.xpose.msra.mxu0 %v1251_v18 }
 0x426   : > { %3000 = vmatprep.subr.bf16.mxu0 %v3648_v55 }
 0x42d   : > { %3001 = vmatpush3.bf16.xpose.msra.mxu0 %v1254_v19 }
 0x42e   : > { %3002 = vmatprep.subr.bf16.mxu0 %v3648_v55 }
 0x435   : > { %3003 = vmatpush3.bf16.xpose.msra.mxu0 %v1257_v21 }
 0x436   : > { %3048 = vmatprep.subr.bf16.mxu0 %v3648_v55 }
 0x43c   : > { %3005 = vmatmul.mubr.msk.bf16.vlgmr.msra.gmra.mrb[16].mxu0 %vm856_vm1, %v1215_v57 }
 0x43d   : > { %3064 = vmatprep.mubr.msk.bf16.mxu0 %vm3649_vm0, %v3648_v55 }
 0x45c   : > { %v4291_v24 = vpop.f32.mrb[8].mxu0 }
 0x45d   : > { %v2946_v26 = vpop.f32.mrb[9].mxu0 }
 0x45e   : > { %v4293_v31 = vpop.f32.mrb[10].mxu0 }
 0x45f   : > { %v1005_v34 = vpack.c.bf16 %v4293_v31, %v4291_v24  ;;  %v2947_v36 = vpop.f32.mrb[11].mxu0  ;;  %v3374_v24 = vld [vmem:[#allocation10] sm:$0xff]   ;;  %v3375_v31 = vld [vmem:[#allocation10 + $0x8] sm:$0xff]  }
 0x4cf   : > { %v4297_v42 = vpop.f32.mrb[12].mxu0 }
 0x4d0   : > { %v2986_v43 = vpop.f32.mrb[13].mxu0 }
 0x4d1   : > { %v4299_v45 = vpop.f32.mrb[14].mxu0 }
 0x4d2   : > { %v1213_v48 = vpack.c.bf16 %v4299_v45, %v4297_v42  ;;  %v2987_v50 = vpop.f32.mrb[15].mxu0 }
 0x50f   : > { %v1293_v53 = vpop.f32.mrb[16].mxu0 }
 0x510   : > { %v3006_v56 = vpop.f32.mrb[17].mxu0 }
 0x511   : > { %v1296_v57 = vpop.f32.mrb[18].mxu0 }
 0x512   : > { %v1300_v60 = vmax.f32 %v1293_v53, %v1296_v57  ;;  %v3007_v27 = vpop.f32.mrb[19].mxu0 }
 0x514   : > { %v1301_v28 = vrot.slane %v1300_v60, 4 }
 0x516   : > { %v1302_v62 = vmax.f32 %v1300_v60, %v1301_v28 }
 0x518   : > { %v1303_v63 = vrot.slane %v1302_v62, 2 }
 0x51a   : > { %v1304_v38 = vmax.f32 %v1302_v62, %v1303_v63 }
 0x51c   : > { %v1305_v40 = vrot.slane %v1304_v38, 1 }
 0x51e   : > { %v1306_v1 = vmax.f32 %v1304_v38, %v1305_v40 }
 0x520   : > { %vm1307_vm4 = vcmp.eq.f32.partialorder %v1293_v53, %v1306_v1  ;;  %vm1308_vm5 = vcmp.eq.f32.partialorder %v1296_v57, %v1306_v1 }
 0x521   : > { %v1309_v5 = vsel %vm1307_vm4, %v4182_v0, 16  ;;  %v1310_v9 = vsel %vm1308_vm5, %v4185_v15, 16 }
 0x522   : > { %vm1311_vm6 = vcmp.lt.s32.totalorder %v1309_v5, %v1310_v9 }
 0x523   : > { %v1312_v10 = vsel %vm1311_vm6, %v1309_v5, %v1310_v9 }
 0x524   : > { %v1313_v18 = vrot.slane %v1312_v10, 4 }
 0x526   : > { %vm1314_vm7 = vcmp.lt.s32.totalorder %v1312_v10, %v1313_v18 }
 0x527   : > { %v1315_v19 = vsel %vm1314_vm7, %v1312_v10, %v1313_v18 }
 0x528   : > { %v1316_v21 = vrot.slane %v1315_v19, 2 }
 0x52a   : > { %vm1317_vm8 = vcmp.lt.s32.totalorder %v1315_v19, %v1316_v21 }
 0x52b   : > { %v1318_v26 = vsel %vm1317_vm8, %v1315_v19, %v1316_v21 }
 0x52c   : > { %v1319_v36 = vrot.slane %v1318_v26, 1 }
 0x52e   : > { %vm1320_vm9 = vcmp.lt.s32.totalorder %v1318_v26, %v1319_v36 }
 0x52f   : > { %v1321_v43 = vsel %vm1320_vm9, %v1318_v26, %v1319_v36 }
 0x530   : > { %vm1323_vm10 = vcmp.eq.s32.totalorder %v4185_v15, %v1321_v43  ;;  %vm1322_vm11 = vcmp.eq.s32.totalorder %v4182_v0, %v1321_v43 }
 0x531   : > { %v2687_v50 = vsel %vm1323_vm10, 1.0, %v3648_v55  ;;  %v2686_v53 = vsel %vm1322_vm11, 1.0, %v3648_v55 }
 0x532   : > { %1330 = vadd.xlane.f32.xlu1 %v2687_v50  ;;  %1328 = vadd.xlane.f32.xlu0 %v2686_v53 }
 0x543   : > { %1353 = vrot.lane.b32.xlu1 %v4094_v22, %s3651_s13 }
 0x547   : > { %1409 = vrot.lane.b32.xlu1 %v4018_v14, %s3652_s7 }
 0x548   : > { %1407 = vrot.lane.b32.xlu0 %v4006_v4, %s3652_s7 }
 0x54b   : > { %1413 = vrot.lane.b32.xlu1 %v4046_v44, %s3652_s7 }
 0x54c   : > { %1411 = vrot.lane.b32.xlu0 %v4032_v33, %s3652_s7 }
 0x54f   : > { %1417 = vrot.lane.b32.xlu1 %v4070_v2, %s3652_s7 }
 0x550   : > { %1415 = vrot.lane.b32.xlu0 %v4058_v54, %s3652_s7 }
 0x553   : > { %1421 = vrot.lane.b32.xlu1 %v4092_v20, %s3652_s7 }
 0x554   : > { %1419 = vrot.lane.b32.xlu0 %v4081_v11, %s3652_s7 }
 0x557   : > { %1530 = vrot.lane.b32.xlu1 %v4008_v7, %s3652_s7 }
 0x558   : > { %1405 = vrot.lane.b32.xlu0 %v4034_v35, %s3652_s7 }
 0x55b   : > { %1536 = vrot.lane.b32.xlu1 %v4048_v47, %s3652_s7 }
 0x55c   : > { %1532 = vrot.lane.b32.xlu0 %v4020_v17, %s3652_s7 }
 0x55f   : > { %1538 = vrot.lane.b32.xlu1 %v4060_v58, %s3652_s7 }
 0x560   : > { %1534 = vrot.lane.b32.xlu0 %v4036_v37, %s3652_s7 }
 0x564   : > { %1540 = vrot.lane.b32.xlu0 %v4072_v6, %s3652_s7 }
 0x5bf   : > { %v1331_v4 = vpop.xlane.xlu1 %1330  ;;  %v1329_v7 = vpop.xlane.xlu0 %1328 }
 0x5c0   : > { %v1333_v14 = vadd.f32 1.0, %v1331_v4  ;;  %v1332_v33 = vadd.f32 1.0, %v1329_v7 }
 0x5c2   : > { %3390 = vrcp.f32 %v1333_v14 }
 0x5c3   : > { %3392 = vrcp.f32 %v1332_v33  ;;  %v1354_v35 = vpop.permute.xlu1 %1353  ;;  %v1408_v44 = vpop.permute.xlu0 %1407 }
 0x5c4   : > { %3023 = vmatpush3.bf16.msra.mxu1 %v1354_v35  ;;  %v1427_v60 = vsel %vm856_vm1, %v1408_v44, 0 }
 0x5c5   : > { %3028 = vmatprep.subr.bf16.mxu1 %v3648_v55 }
 0x5c7   : > { %v1410_v17 = vpop.permute.xlu1 %1409  ;;  %v1412_v47 = vpop.permute.xlu0 %1411 }
 0x5c8   : > { %v1430_v38 = vsel %vm856_vm1, %v1410_v17, 0  ;;  %v1433_v5 = vsel %vm856_vm1, %v1412_v47, 0 }
 0x5cb   : > { %v1414_v54 = vpop.permute.xlu1 %1413  ;;  %v1416_v58 = vpop.permute.xlu0 %1415 }
 0x5cc   : > { %v3391_v2 = vpop.eup %3390  ;;  %v1436_v10 = vsel %vm856_vm1, %v1414_v54, 0  ;;  %v1439_v19 = vsel %vm856_vm1, %v1416_v58, 0 }
 0x5cd   : > { %v3393_v37 = vpop.eup %3392  ;;  %v1337_v11 = vmul.f32 %v3391_v2, %v2687_v50 }
 0x5ce   : > { %v1336_v20 = vmul.f32 %v3393_v37, %v2686_v53 }
 0x5cf   : > { %v1418_v6 = vpop.permute.xlu1 %1417  ;;  %v1420_v56 = vpop.permute.xlu0 %1419 }
 0x5d0   : > { %v1338_v57 = vpack.c.bf16 %v1337_v11, %v1336_v20  ;;  %v1442_v21 = vsel %vm856_vm1, %v1418_v6, 0  ;;  %v1445_v26 = vsel %vm856_vm1, %v1420_v56, 0 }
 0x5d2   : > { %3025 = vmatmul.mubr.bf16.vlgmr.msra.gmra.mrb[68].mxu1 %v1338_v57 }
 0x5d3   : > { %3029 = vmatpush3.bf16.xpose.msra.mxu1 %v1427_v60  ;;  %v1422_v27 = vpop.permute.xlu1 %1421  ;;  %v1406_v28 = vpop.permute.xlu0 %1405  ;;  %3044 = vmatprep.mubr.msk.bf16.mxu1 %vm3649_vm0, %v3648_v55 }
 0x5d4   : > { %3030 = vmatprep.subr.bf16.mxu1 %v3648_v55  ;;  %v1448_v36 = vsel %vm856_vm1, %v1422_v27, 0 }
 0x5d7   : > { %v1531_v62 = vpop.permute.xlu1 %1530  ;;  %v1533_v63 = vpop.permute.xlu0 %1532 }
 0x5d8   : > { %3049 = vmatpush3.bf16.msra.mxu0 %v1531_v62 }
 0x5d9   : > { %3050 = vmatprep.subr.bf16.mxu0 %v3648_v55 }
 0x5db   : > { %3031 = vmatpush3.bf16.xpose.msra.mxu1 %v1430_v38  ;;  %v1535_v40 = vpop.permute.xlu0 %1534  ;;  %v1537_v1 = vpop.permute.xlu1 %1536 }
 0x5dc   : > { %3051 = vmatpush3.bf16.msra.mxu0 %v1533_v63  ;;  %3032 = vmatprep.subr.bf16.mxu1 %v3648_v55 }
 0x5dd   : > { %3052 = vmatprep.subr.bf16.mxu0 %v3648_v55 }
 0x5df   : > { %v1539_v9 = vpop.permute.xlu1 %1538  ;;  %v1541_v18 = vpop.permute.xlu0 %1540 }
 0x5e0   : > { %3053 = vmatpush3.bf16.msra.mxu0 %v1535_v40 }
 0x5e1   : > { %3054 = vmatprep.subr.bf16.mxu0 %v3648_v55 }
 0x5e3   : > { %3033 = vmatpush3.bf16.xpose.msra.mxu1 %v1433_v5 }
 0x5e4   : > { %3055 = vmatpush3.bf16.msra.mxu0 %v1537_v1  ;;  %3034 = vmatprep.subr.bf16.mxu1 %v3648_v55 }
 0x5e5   : > { %3056 = vmatprep.subr.bf16.mxu0 %v3648_v55 }
 0x5e8   : > { %3057 = vmatpush3.bf16.msra.mxu0 %v1539_v9 }
 0x5e9   : > { %3058 = vmatprep.subr.bf16.mxu0 %v3648_v55 }
 0x5eb   : > { %3035 = vmatpush3.bf16.xpose.msra.mxu1 %v1436_v10 }
 0x5ec   : > { %3059 = vmatpush3.bf16.msra.mxu0 %v1541_v18  ;;  %3036 = vmatprep.subr.bf16.mxu1 %v3648_v55 }
 0x5ed   : > { %3060 = vmatprep.subr.bf16.mxu0 %v3648_v55 }
 0x5f3   : > { %3037 = vmatpush3.bf16.xpose.msra.mxu1 %v1439_v19 }
 0x5f4   : > { %3038 = vmatprep.subr.bf16.mxu1 %v3648_v55 }
 0x5fb   : > { %3039 = vmatpush3.bf16.xpose.msra.mxu1 %v1442_v21 }
 0x5fc   : > { %3040 = vmatprep.subr.bf16.mxu1 %v3648_v55 }
 0x603   : > { %3041 = vmatpush3.bf16.xpose.msra.mxu1 %v1445_v26 }
 0x604   : > { %3042 = vmatprep.subr.bf16.mxu1 %v3648_v55 }
 0x60b   : > { %3043 = vmatpush3.bf16.xpose.msra.mxu1 %v1448_v36 }
 0x60c   : > { %3088 = vmatprep.subr.bf16.mxu1 %v3648_v55 }
 0x612   : > { %3045 = vmatmul.mubr.msk.bf16.vlgmr.msra.gmra.mrb[72].mxu1 %vm856_vm1, %v1406_v28 }
 0x613   : > { %3089 = vmatpush3.bf16.msra.mxu1 %v4152_v52  ;;  %3104 = vmatprep.mubr.msk.bf16.mxu1 %vm3649_vm0, %v3648_v55 }
 0x614   : > { %3090 = vmatprep.subr.bf16.mxu1 %v3648_v55 }
 0x617   : > { %3091 = vmatpush3.bf16.msra.mxu1 %v4156_v61 }
 0x618   : > { %3092 = vmatprep.subr.bf16.mxu1 %v3648_v55 }
 0x61b   : > { %3093 = vmatpush3.bf16.msra.mxu1 %v4160_v8 }
 0x61c   : > { %3094 = vmatprep.subr.bf16.mxu1 %v3648_v55 }
 0x61f   : > { %3095 = vmatpush3.bf16.msra.mxu1 %v4164_v16 }
 0x620   : > { %3096 = vmatprep.subr.bf16.mxu1 %v3648_v55 }
 0x623   : > { %3097 = vmatpush3.bf16.msra.mxu1 %v4168_v25 }
 0x624   : > { %3098 = vmatprep.subr.bf16.mxu1 %v3648_v55 }
 0x627   : > { %3099 = vmatpush3.bf16.msra.mxu1 %v4172_v32 }
 0x628   : > { %3100 = vmatprep.subr.bf16.mxu1 %v3648_v55 }
 0x62b   : > { %3101 = vmatpush3.bf16.msra.mxu1 %v4176_v41 }
 0x62c   : > { %3102 = vmatprep.subr.bf16.mxu1 %v3648_v55 }
 0x62f   : > { %3103 = vmatpush3.bf16.msra.mxu1 %v4180_v49 }
 0x630   : > { %3108 = vmatprep.subr.bf16.mxu1 %v3648_v55 }
 0x6a5   : > { %v4385_v43 = vpop.f32.mrb[68].mxu1 }
 0x6a6   : > { %v3026_v50 = vpop.f32.mrb[69].mxu1 }
 0x6a7   : > { %v4387_v53 = vpop.f32.mrb[70].mxu1 }
 0x6a8   : > { %v1404_v4 = vpack.c.bf16 %v4387_v53, %v4385_v43  ;;  %v3027_v7 = vpop.f32.mrb[71].mxu1 }
 0x6a9   : > { %v1622_v7 = vsel %vm856_vm1, %v4154_v59, 0 }
 0x6e5   : > { %v1484_v14 = vpop.f32.mrb[72].mxu1 }
 0x6e6   : > { %v3046_v33 = vpop.f32.mrb[73].mxu1 }
 0x6e7   : > { %v1487_v35 = vpop.f32.mrb[74].mxu1  ;;  %v1628_v33 = vsel %vm856_vm1, %v4162_v12, 0 }
 0x6e8   : > { %v1491_v44 = vmax.f32 %v1484_v14, %v1487_v35  ;;  %v3047_v17 = vpop.f32.mrb[75].mxu1 }
 0x6e9   : > { %v1637_v17 = vsel %vm856_vm1, %v4174_v39, 0 }
 0x6ea   : > { %v1492_v47 = vrot.slane %v1491_v44, 4 }
 0x6ec   : > { %v1493_v54 = vmax.f32 %v1491_v44, %v1492_v47  ;;  %v1634_v44 = vsel %vm856_vm1, %v4170_v29, 0  ;;  %v1640_v47 = vsel %vm856_vm1, %v4178_v46, 0 }
 0x6ee   : > { %v1494_v58 = vrot.slane %v1493_v54, 2 }
 0x6f0   : > { %v1495_v2 = vmax.f32 %v1493_v54, %v1494_v58 }
 0x6f2   : > { %v1496_v37 = vrot.slane %v1495_v2, 1 }
 0x6f4   : > { %v1497_v11 = vmax.f32 %v1495_v2, %v1496_v37 }
 0x6f6   : > { %vm1498_vm12 = vcmp.eq.f32.partialorder %v1484_v14, %v1497_v11  ;;  %vm1499_vm13 = vcmp.eq.f32.partialorder %v1487_v35, %v1497_v11  ;;  %v1625_v14 = vsel %vm856_vm1, %v4158_v3, 0  ;;  %v1631_v35 = vsel %vm856_vm1, %v4166_v23, 0 }
 0x6f7   : > { %v1500_v20 = vsel %vm1498_vm12, %v4182_v0, 16  ;;  %v1501_v6 = vsel %vm1499_vm13, %v4185_v15, 16 }
 0x6f8   : > { %vm1502_vm14 = vcmp.lt.s32.totalorder %v1500_v20, %v1501_v6 }
 0x6f9   : > { %v1503_v56 = vsel %vm1502_vm14, %v1500_v20, %v1501_v6 }
 0x6fa   : > { %v1504_v57 = vrot.slane %v1503_v56, 4 }
 0x6fc   : > { %vm1505_vm15 = vcmp.lt.s32.totalorder %v1503_v56, %v1504_v57 }
 0x6fd   : > { %v1506_v60 = vsel %vm1505_vm15, %v1503_v56, %v1504_v57 }
 0x6fe   : > { %v1507_v27 = vrot.slane %v1506_v60, 2 }
 0x700   : > { %vm1508_vm2 = vcmp.lt.s32.totalorder %v1506_v60, %v1507_v27 }
 0x701   : > { %v1509_v28 = vsel %vm1508_vm2, %v1506_v60, %v1507_v27 }
 0x702   : > { %v1510_v62 = vrot.slane %v1509_v28, 1 }
 0x704   : > { %vm1511_vm3 = vcmp.lt.s32.totalorder %v1509_v28, %v1510_v62 }
 0x705   : > { %v1512_v63 = vsel %vm1511_vm3, %v1509_v28, %v1510_v62 }
 0x706   : > { %vm1514_vm4 = vcmp.eq.s32.totalorder %v4185_v15, %v1512_v63  ;;  %vm1513_vm5 = vcmp.eq.s32.totalorder %v4182_v0, %v1512_v63 }
 0x707   : > { %v2690_v38 = vsel %vm1514_vm4, 1.0, %v3648_v55  ;;  %v2689_v40 = vsel %vm1513_vm5, 1.0, %v3648_v55 }
 0x708   : > { %1521 = vadd.xlane.f32.xlu0 %v2690_v38  ;;  %1519 = vadd.xlane.f32.xlu1 %v2689_v40 }
 0x719   : > { %1542 = vrot.lane.b32.xlu1 %v4083_v13, %s3652_s7 }
 0x71e   : > { %1544 = vrot.lane.b32.xlu0 %v4094_v22, %s3652_s7  ;;  %v1619_v22 = vsel %vm856_vm1, %v4150_v51, 0 }
 0x795   : > { %v1520_v1 = vpop.xlane.xlu1 %1519  ;;  %v1522_v5 = vpop.xlane.xlu0 %1521 }
 0x796   : > { %v1523_v9 = vadd.f32 1.0, %v1520_v1  ;;  %v1524_v10 = vadd.f32 1.0, %v1522_v5 }
 0x798   : > { %3394 = vrcp.f32 %v1523_v9 }
 0x799   : > { %3396 = vrcp.f32 %v1524_v10  ;;  %v1543_v18 = vpop.permute.xlu1 %1542  ;;  %v1545_v19 = vpop.permute.xlu0 %1544 }
 0x79a   : > { %3061 = vmatpush3.bf16.msra.mxu0 %v1543_v18 }
 0x79b   : > { %3062 = vmatprep.subr.bf16.mxu0 %v3648_v55 }
 0x79e   : > { %3063 = vmatpush3.bf16.msra.mxu0 %v1545_v19 }
 0x79f   : > { %3068 = vmatprep.subr.bf16.mxu0 %v3648_v55 }
 0x7a2   : > { %v3395_v21 = vpop.eup %3394 }
 0x7a3   : > { %v3397_v26 = vpop.eup %3396  ;;  %v1527_v13 = vmul.f32 %v3395_v21, %v2689_v40 }
 0x7a4   : > { %v1528_v36 = vmul.f32 %v3397_v26, %v2690_v38 }
 0x7a6   : > { %v1529_v50 = vpack.c.bf16 %v1528_v36, %v1527_v13 }
 0x7a8   : > { %3065 = vmatmul.mubr.bf16.vlgmr.msra.gmra.mrb[20].mxu0 %v1529_v50 }
 0x7a9   : > { %3069 = vmatpush3.bf16.xpose.msra.mxu0 %v1619_v22  ;;  %3084 = vmatprep.mubr.msk.bf16.mxu0 %vm3649_vm0, %v3648_v55 }
 0x7aa   : > { %3070 = vmatprep.subr.bf16.mxu0 %v3648_v55 }
 0x7b1   : > { %3071 = vmatpush3.bf16.xpose.msra.mxu0 %v1622_v7 }
 0x7b2   : > { %3072 = vmatprep.subr.bf16.mxu0 %v3648_v55 }
 0x7b9   : > { %3073 = vmatpush3.bf16.xpose.msra.mxu0 %v1625_v14 }
 0x7ba   : > { %3074 = vmatprep.subr.bf16.mxu0 %v3648_v55 }
 0x7c1   : > { %3075 = vmatpush3.bf16.xpose.msra.mxu0 %v1628_v33 }
 0x7c2   : > { %3076 = vmatprep.subr.bf16.mxu0 %v3648_v55 }
 0x7c9   : > { %3077 = vmatpush3.bf16.xpose.msra.mxu0 %v1631_v35 }
 0x7ca   : > { %3078 = vmatprep.subr.bf16.mxu0 %v3648_v55 }
 0x7d1   : > { %3079 = vmatpush3.bf16.xpose.msra.mxu0 %v1634_v44 }
 0x7d2   : > { %3080 = vmatprep.subr.bf16.mxu0 %v3648_v55 }
 0x7d9   : > { %3081 = vmatpush3.bf16.xpose.msra.mxu0 %v1637_v17 }
 0x7da   : > { %3082 = vmatprep.subr.bf16.mxu0 %v3648_v55 }
 0x7e1   : > { %3083 = vmatpush3.bf16.xpose.msra.mxu0 %v1640_v47 }
 0x7e2   : > { %3128 = vmatprep.subr.bf16.mxu0 %v3648_v55 }
 0x7e8   : > { %3085 = vmatmul.mubr.msk.bf16.vlgmr.msra.gmra.mrb[24].mxu0 %vm856_vm1, %v4028_v30 }
 0x7e9   : > { %3144 = vmatprep.mubr.msk.bf16.mxu0 %vm3649_vm0, %v3648_v55 }
 0x87b   : > { %v4433_v54 = vpop.f32.mrb[20].mxu0 }
 0x87c   : > { %v3066_v58 = vpop.f32.mrb[21].mxu0 }
 0x87d   : > { %v4435_v2 = vpop.f32.mrb[22].mxu0 }
 0x87e   : > { %v1595_v37 = vpack.c.bf16 %v4435_v2, %v4433_v54  ;;  %v3067_v11 = vpop.f32.mrb[23].mxu0 }
 0x8bb   : > { %v1676_v20 = vpop.f32.mrb[24].mxu0 }
 0x8bc   : > { %v3086_v6 = vpop.f32.mrb[25].mxu0 }
 0x8bd   : > { %v1679_v56 = vpop.f32.mrb[26].mxu0 }
 0x8be   : > { %v1683_v57 = vmax.f32 %v1676_v20, %v1679_v56  ;;  %v3087_v60 = vpop.f32.mrb[27].mxu0 }
 0x8c0   : > { %v1684_v27 = vrot.slane %v1683_v57, 4 }
 0x8c2   : > { %v1685_v28 = vmax.f32 %v1683_v57, %v1684_v27 }
 0x8c4   : > { %v1686_v62 = vrot.slane %v1685_v28, 2 }
 0x8c6   : > { %v1687_v63 = vmax.f32 %v1685_v28, %v1686_v62 }
 0x8c8   : > { %v1688_v38 = vrot.slane %v1687_v63, 1 }
 0x8ca   : > { %v1689_v40 = vmax.f32 %v1687_v63, %v1688_v38 }
 0x8cc   : > { %vm1690_vm6 = vcmp.eq.f32.partialorder %v1676_v20, %v1689_v40  ;;  %vm1691_vm7 = vcmp.eq.f32.partialorder %v1679_v56, %v1689_v40 }
 0x8cd   : > { %v1692_v1 = vsel %vm1690_vm6, %v4182_v0, 16  ;;  %v1693_v5 = vsel %vm1691_vm7, %v4185_v15, 16 }
 0x8ce   : > { %vm1694_vm8 = vcmp.lt.s32.totalorder %v1692_v1, %v1693_v5 }
 0x8cf   : > { %v1695_v9 = vsel %vm1694_vm8, %v1692_v1, %v1693_v5 }
 0x8d0   : > { %v1696_v10 = vrot.slane %v1695_v9, 4 }
 0x8d2   : > { %vm1697_vm9 = vcmp.lt.s32.totalorder %v1695_v9, %v1696_v10 }
 0x8d3   : > { %v1698_v18 = vsel %vm1697_vm9, %v1695_v9, %v1696_v10 }
 0x8d4   : > { %v1699_v19 = vrot.slane %v1698_v18, 2 }
 0x8d6   : > { %vm1700_vm10 = vcmp.lt.s32.totalorder %v1698_v18, %v1699_v19 }
 0x8d7   : > { %v1701_v21 = vsel %vm1700_vm10, %v1698_v18, %v1699_v19 }
 0x8d8   : > { %v1702_v26 = vrot.slane %v1701_v21, 1 }
 0x8da   : > { %vm1703_vm11 = vcmp.lt.s32.totalorder %v1701_v21, %v1702_v26 }
 0x8db   : > { %v1704_v13 = vsel %vm1703_vm11, %v1701_v21, %v1702_v26 }
 0x8dc   : > { %vm1706_vm12 = vcmp.eq.s32.totalorder %v4185_v15, %v1704_v13  ;;  %vm1705_vm13 = vcmp.eq.s32.totalorder %v4182_v0, %v1704_v13 }
 0x8dd   : > { %v2693_v36 = vsel %vm1706_vm12, 1.0, %v3648_v55  ;;  %v2692_v50 = vsel %vm1705_vm13, 1.0, %v3648_v55 }
 0x8de   : > { %1713 = vadd.xlane.f32.xlu0 %v2693_v36  ;;  %1711 = vadd.xlane.f32.xlu1 %v2692_v50 }
 0x8ef   : > { %1777 = vrot.lane.b32.xlu1 %v4154_v59, %s3650_s27 }
 0x8f3   : > { %1779 = vrot.lane.b32.xlu1 %v4158_v3, %s3650_s27 }
 0x8f4   : > { %1775 = vrot.lane.b32.xlu0 %v4150_v51, %s3650_s27 }
 0x8f7   : > { %1783 = vrot.lane.b32.xlu1 %v4166_v23, %s3650_s27 }
 0x8f8   : > { %1781 = vrot.lane.b32.xlu0 %v4162_v12, %s3650_s27 }
 0x8fb   : > { %1787 = vrot.lane.b32.xlu1 %v4174_v39, %s3650_s27 }
 0x8fc   : > { %1785 = vrot.lane.b32.xlu0 %v4170_v29, %s3650_s27 }
 0x8ff   : > { %1765 = vrot.lane.b32.xlu1 %v4028_v30, %s3650_s27 }
 0x900   : > { %1789 = vrot.lane.b32.xlu0 %v4178_v46, %s3650_s27 }
 0x903   : > { %1908 = vrot.lane.b32.xlu1 %v4156_v61, %s3650_s27 }
 0x904   : > { %1906 = vrot.lane.b32.xlu0 %v4152_v52, %s3650_s27 }
 0x907   : > { %1912 = vrot.lane.b32.xlu1 %v4164_v16, %s3650_s27 }
 0x908   : > { %1910 = vrot.lane.b32.xlu0 %v4160_v8, %s3650_s27 }
 0x90b   : > { %1916 = vrot.lane.b32.xlu1 %v4172_v32, %s3650_s27 }
 0x90c   : > { %1914 = vrot.lane.b32.xlu0 %v4168_v25, %s3650_s27 }
 0x910   : > { %1918 = vrot.lane.b32.xlu0 %v4176_v41, %s3650_s27 }
 0x96b   : > { %v1714_v22 = vpop.xlane.xlu0 %1713  ;;  %v1712_v7 = vpop.xlane.xlu1 %1711 }
 0x96c   : > { %v1716_v14 = vadd.f32 1.0, %v1714_v22  ;;  %v1715_v33 = vadd.f32 1.0, %v1712_v7 }
 0x96e   : > { %3398 = vrcp.f32 %v1716_v14 }
 0x96f   : > { %3400 = vrcp.f32 %v1715_v33  ;;  %v1776_v35 = vpop.permute.xlu0 %1775  ;;  %v1778_v44 = vpop.permute.xlu1 %1777 }
 0x970   : > { %v1795_v62 = vsel %vm856_vm1, %v1776_v35, 0  ;;  %v1798_v1 = vsel %vm856_vm1, %v1778_v44, 0 }
 0x973   : > { %v1782_v17 = vpop.permute.xlu0 %1781  ;;  %v1780_v47 = vpop.permute.xlu1 %1779 }
 0x974   : > { %v1801_v10 = vsel %vm856_vm1, %v1780_v47, 0  ;;  %v1804_v21 = vsel %vm856_vm1, %v1782_v17, 0 }
 0x977   : > { %v1786_v58 = vpop.permute.xlu0 %1785  ;;  %v1784_v11 = vpop.permute.xlu1 %1783 }
 0x978   : > { %v3399_v20 = vpop.eup %3398  ;;  %v1807_v13 = vsel %vm856_vm1, %v1784_v11, 0 }
 0x979   : > { %v3401_v6 = vpop.eup %3400  ;;  %v1720_v56 = vmul.f32 %v3399_v20, %v2693_v36  ;;  %v1810_v36 = vsel %vm856_vm1, %v1786_v58, 0 }
 0x97a   : > { %v1719_v57 = vmul.f32 %v3401_v6, %v2692_v50 }
 0x97b   : > { %v1790_v60 = vpop.permute.xlu0 %1789  ;;  %v1788_v27 = vpop.permute.xlu1 %1787 }
 0x97c   : > { %v1721_v28 = vpack.c.bf16 %v1720_v56, %v1719_v57  ;;  %v1813_v50 = vsel %vm856_vm1, %v1788_v27, 0  ;;  %v1816_v22 = vsel %vm856_vm1, %v1790_v60, 0 }
 0x97e   : > { %3105 = vmatmul.mubr.bf16.vlgmr.msra.gmra.mrb[76].mxu1 %v1721_v28 }
 0x97f   : > { %3109 = vmatpush3.bf16.xpose.msra.mxu1 %v1795_v62  ;;  %v1907_v63 = vpop.permute.xlu0 %1906  ;;  %v1766_v38 = vpop.permute.xlu1 %1765  ;;  %3124 = vmatprep.mubr.msk.bf16.mxu1 %vm3649_vm0, %v3648_v55 }
 0x980   : > { %3129 = vmatpush3.bf16.msra.mxu0 %v1907_v63  ;;  %3110 = vmatprep.subr.bf16.mxu1 %v3648_v55 }
 0x981   : > { %3130 = vmatprep.subr.bf16.mxu0 %v3648_v55 }
 0x983   : > { %v1909_v40 = vpop.permute.xlu1 %1908  ;;  %v1911_v5 = vpop.permute.xlu0 %1910 }
 0x984   : > { %3131 = vmatpush3.bf16.msra.mxu0 %v1909_v40 }
 0x985   : > { %3132 = vmatprep.subr.bf16.mxu0 %v3648_v55 }
 0x987   : > { %3111 = vmatpush3.bf16.xpose.msra.mxu1 %v1798_v1  ;;  %v1913_v9 = vpop.permute.xlu1 %1912  ;;  %v1915_v18 = vpop.permute.xlu0 %1914 }
 0x988   : > { %3133 = vmatpush3.bf16.msra.mxu0 %v1911_v5  ;;  %3112 = vmatprep.subr.bf16.mxu1 %v3648_v55 }
 0x989   : > { %3134 = vmatprep.subr.bf16.mxu0 %v3648_v55 }
 0x98b   : > { %v1917_v19 = vpop.permute.xlu1 %1916  ;;  %v1919_v26 = vpop.permute.xlu0 %1918 }
 0x98c   : > { %3135 = vmatpush3.bf16.msra.mxu0 %v1913_v9 }
 0x98d   : > { %3136 = vmatprep.subr.bf16.mxu0 %v3648_v55 }
 0x98f   : > { %3113 = vmatpush3.bf16.xpose.msra.mxu1 %v1801_v10 }
 0x990   : > { %3137 = vmatpush3.bf16.msra.mxu0 %v1915_v18  ;;  %3114 = vmatprep.subr.bf16.mxu1 %v3648_v55 }
 0x991   : > { %3138 = vmatprep.subr.bf16.mxu0 %v3648_v55 }
 0x994   : > { %3139 = vmatpush3.bf16.msra.mxu0 %v1917_v19 }
 0x995   : > { %3140 = vmatprep.subr.bf16.mxu0 %v3648_v55 }
 0x997   : > { %3115 = vmatpush3.bf16.xpose.msra.mxu1 %v1804_v21 }
 0x998   : > { %3141 = vmatpush3.bf16.msra.mxu0 %v1919_v26  ;;  %3116 = vmatprep.subr.bf16.mxu1 %v3648_v55 }
 0x999   : > { %3142 = vmatprep.subr.bf16.mxu0 %v3648_v55 }
 0x99f   : > { %3117 = vmatpush3.bf16.xpose.msra.mxu1 %v1807_v13 }
 0x9a0   : > { %3118 = vmatprep.subr.bf16.mxu1 %v3648_v55 }
 0x9a7   : > { %3119 = vmatpush3.bf16.xpose.msra.mxu1 %v1810_v36 }
 0x9a8   : > { %3120 = vmatprep.subr.bf16.mxu1 %v3648_v55 }
 0x9af   : > { %3121 = vmatpush3.bf16.xpose.msra.mxu1 %v1813_v50 }
 0x9b0   : > { %3122 = vmatprep.subr.bf16.mxu1 %v3648_v55 }
 0x9b7   : > { %3123 = vmatpush3.bf16.xpose.msra.mxu1 %v1816_v22 }
 0x9b8   : > { %3168 = vmatprep.subr.bf16.mxu1 %v3648_v55 }
 0x9be   : > { %3125 = vmatmul.mubr.msk.bf16.vlgmr.msra.gmra.mrb[80].mxu1 %vm856_vm1, %v1766_v38 }
 0x9bf   : > { %3184 = vmatprep.mubr.msk.bf16.mxu1 %vm3649_vm0, %v3648_v55 }
 0xa51   : > { %v4505_v7 = vpop.f32.mrb[76].mxu1 }
 0xa52   : > { %v3106_v14 = vpop.f32.mrb[77].mxu1 }
 0xa53   : > { %v4507_v33 = vpop.f32.mrb[78].mxu1 }
 0xa54   : > { %v1763_v35 = vpack.c.bf16 %v4507_v33, %v4505_v7  ;;  %v3107_v44 = vpop.f32.mrb[79].mxu1  ;;  %v3377_v7 = vld [vmem:[#allocation10 + $0x18] sm:$0xff]   ;;  %v3378_v33 = vld [vmem:[#allocation10 + $0x20] sm:$0xff]  }
 0xa91   : > { %v1852_v17 = vpop.f32.mrb[80].mxu1 }
 0xa92   : > { %v3126_v47 = vpop.f32.mrb[81].mxu1 }
 0xa93   : > { %v1855_v58 = vpop.f32.mrb[82].mxu1 }
 0xa94   : > { %v1859_v11 = vmax.f32 %v1852_v17, %v1855_v58  ;;  %v3127_v20 = vpop.f32.mrb[83].mxu1 }
 0xa96   : > { %v1860_v6 = vrot.slane %v1859_v11, 4 }
 0xa98   : > { %v1861_v56 = vmax.f32 %v1859_v11, %v1860_v6 }
 0xa9a   : > { %v1862_v57 = vrot.slane %v1861_v56, 2 }
 0xa9c   : > { %v1863_v60 = vmax.f32 %v1861_v56, %v1862_v57 }
 0xa9e   : > { %v1864_v27 = vrot.slane %v1863_v60, 1 }
 0xaa0   : > { %v1865_v28 = vmax.f32 %v1863_v60, %v1864_v27 }
 0xaa2   : > { %vm1866_vm14 = vcmp.eq.f32.partialorder %v1852_v17, %v1865_v28  ;;  %vm1867_vm15 = vcmp.eq.f32.partialorder %v1855_v58, %v1865_v28 }
 0xaa3   : > { %v1868_v62 = vsel %vm1866_vm14, %v4182_v0, 16  ;;  %v1869_v63 = vsel %vm1867_vm15, %v4185_v15, 16 }
 0xaa4   : > { %vm1870_vm2 = vcmp.lt.s32.totalorder %v1868_v62, %v1869_v63 }
 0xaa5   : > { %v1871_v38 = vsel %vm1870_vm2, %v1868_v62, %v1869_v63 }
 0xaa6   : > { %v1872_v40 = vrot.slane %v1871_v38, 4 }
 0xaa8   : > { %vm1873_vm3 = vcmp.lt.s32.totalorder %v1871_v38, %v1872_v40 }
 0xaa9   : > { %v1874_v1 = vsel %vm1873_vm3, %v1871_v38, %v1872_v40 }
 0xaaa   : > { %v1875_v5 = vrot.slane %v1874_v1, 2 }
 0xaac   : > { %vm1876_vm4 = vcmp.lt.s32.totalorder %v1874_v1, %v1875_v5 }
 0xaad   : > { %v1877_v9 = vsel %vm1876_vm4, %v1874_v1, %v1875_v5 }
 0xaae   : > { %v1878_v10 = vrot.slane %v1877_v9, 1 }
 0xab0   : > { %vm1879_vm5 = vcmp.lt.s32.totalorder %v1877_v9, %v1878_v10 }
 0xab1   : > { %v1880_v18 = vsel %vm1879_vm5, %v1877_v9, %v1878_v10 }
 0xab2   : > { %vm1882_vm6 = vcmp.eq.s32.totalorder %v4185_v15, %v1880_v18  ;;  %vm1881_vm7 = vcmp.eq.s32.totalorder %v4182_v0, %v1880_v18 }
 0xab3   : > { %v2696_v19 = vsel %vm1882_vm6, 1.0, %v3648_v55  ;;  %v2695_v21 = vsel %vm1881_vm7, 1.0, %v3648_v55 }
 0xab4   : > { %1889 = vadd.xlane.f32.xlu1 %v2696_v19  ;;  %1887 = vadd.xlane.f32.xlu0 %v2695_v21 }
 0xac5   : > { %1920 = vrot.lane.b32.xlu1 %v4180_v49, %s3650_s27 }
 0xac9   : > { %1976 = vrot.lane.b32.xlu1 %v4154_v59, %s3651_s13 }
 0xaca   : > { %1974 = vrot.lane.b32.xlu0 %v4150_v51, %s3651_s13 }
 0xacd   : > { %1980 = vrot.lane.b32.xlu1 %v4162_v12, %s3651_s13 }
 0xace   : > { %1978 = vrot.lane.b32.xlu0 %v4158_v3, %s3651_s13 }
 0xad1   : > { %1984 = vrot.lane.b32.xlu1 %v4170_v29, %s3651_s13 }
 0xad2   : > { %1982 = vrot.lane.b32.xlu0 %v4166_v23, %s3651_s13 }
 0xad5   : > { %1988 = vrot.lane.b32.xlu1 %v4178_v46, %s3651_s13 }
 0xad6   : > { %1986 = vrot.lane.b32.xlu0 %v4174_v39, %s3651_s13 }
 0xad9   : > { %2097 = vrot.lane.b32.xlu1 %v4152_v52, %s3651_s13 }
 0xada   : > { %1972 = vrot.lane.b32.xlu0 %v4028_v30, %s3651_s13 }
 0xadd   : > { %2103 = vrot.lane.b32.xlu1 %v4164_v16, %s3651_s13 }
 0xade   : > { %2099 = vrot.lane.b32.xlu0 %v4156_v61, %s3651_s13 }
 0xae1   : > { %2105 = vrot.lane.b32.xlu1 %v4168_v25, %s3651_s13 }
 0xae2   : > { %2101 = vrot.lane.b32.xlu0 %v4160_v8, %s3651_s13 }
 0xae5   : > { %2109 = vrot.lane.b32.xlu1 %v4176_v41, %s3651_s13 }
 0xae6   : > { %2107 = vrot.lane.b32.xlu0 %v4172_v32, %s3651_s13 }
 0xb41   : > { %v1888_v26 = vpop.xlane.xlu0 %1887  ;;  %v1890_v13 = vpop.xlane.xlu1 %1889 }
 0xb42   : > { %v1891_v36 = vadd.f32 1.0, %v1888_v26  ;;  %v1892_v50 = vadd.f32 1.0, %v1890_v13 }
 0xb44   : > { %3402 = vrcp.f32 %v1891_v36 }
 0xb45   : > { %3404 = vrcp.f32 %v1892_v50  ;;  %v1975_v22 = vpop.permute.xlu0 %1974  ;;  %v1921_v14 = vpop.permute.xlu1 %1920 }
 0xb46   : > { %3143 = vmatpush3.bf16.msra.mxu0 %v1921_v14  ;;  %v1994_v28 = vsel %vm856_vm1, %v1975_v22, 0 }
 0xb47   : > { %3148 = vmatprep.subr.bf16.mxu0 %v3648_v55 }
 0xb49   : > { %v1979_v44 = vpop.permute.xlu0 %1978  ;;  %v1977_v17 = vpop.permute.xlu1 %1976 }
 0xb4a   : > { %v1997_v1 = vsel %vm856_vm1, %v1977_v17, 0  ;;  %v2000_v10 = vsel %vm856_vm1, %v1979_v44, 0 }
 0xb4d   : > { %v1983_v47 = vpop.permute.xlu0 %1982  ;;  %v1981_v58 = vpop.permute.xlu1 %1980 }
 0xb4e   : > { %v3403_v11 = vpop.eup %3402  ;;  %v2006_v13 = vsel %vm856_vm1, %v1983_v47, 0 }
 0xb4f   : > { %v3405_v20 = vpop.eup %3404  ;;  %v1895_v6 = vmul.f32 %v3403_v11, %v2695_v21 }
 0xb50   : > { %v1896_v56 = vmul.f32 %v3405_v20, %v2696_v19  ;;  %v2003_v19 = vsel %vm856_vm1, %v1981_v58, 0 }
 0xb51   : > { %v1987_v57 = vpop.permute.xlu0 %1986  ;;  %v1985_v60 = vpop.permute.xlu1 %1984 }
 0xb52   : > { %v1897_v27 = vpack.c.bf16 %v1896_v56, %v1895_v6  ;;  %v2009_v36 = vsel %vm856_vm1, %v1985_v60, 0  ;;  %v2012_v50 = vsel %vm856_vm1, %v1987_v57, 0 }
 0xb54   : > { %3145 = vmatmul.mubr.bf16.vlgmr.msra.gmra.mrb[28].mxu0 %v1897_v27 }
 0xb55   : > { %3149 = vmatpush3.bf16.xpose.msra.mxu0 %v1994_v28  ;;  %v1973_v62 = vpop.permute.xlu0 %1972  ;;  %v1989_v63 = vpop.permute.xlu1 %1988  ;;  %3164 = vmatprep.mubr.msk.bf16.mxu0 %vm3649_vm0, %v3648_v55 }
 0xb56   : > { %3150 = vmatprep.subr.bf16.mxu0 %v3648_v55  ;;  %v2015_v22 = vsel %vm856_vm1, %v1989_v63, 0 }
 0xb59   : > { %v2098_v38 = vpop.permute.xlu1 %2097  ;;  %v2100_v40 = vpop.permute.xlu0 %2099 }
 0xb5a   : > { %3169 = vmatpush3.bf16.msra.mxu1 %v2098_v38 }
 0xb5b   : > { %3170 = vmatprep.subr.bf16.mxu1 %v3648_v55 }
 0xb5d   : > { %3151 = vmatpush3.bf16.xpose.msra.mxu0 %v1997_v1  ;;  %v2102_v5 = vpop.permute.xlu0 %2101  ;;  %v2104_v9 = vpop.permute.xlu1 %2103 }
 0xb5e   : > { %3171 = vmatpush3.bf16.msra.mxu1 %v2100_v40  ;;  %3152 = vmatprep.subr.bf16.mxu0 %v3648_v55 }
 0xb5f   : > { %3172 = vmatprep.subr.bf16.mxu1 %v3648_v55 }
 0xb61   : > { %v2106_v18 = vpop.permute.xlu1 %2105  ;;  %v2108_v21 = vpop.permute.xlu0 %2107 }
 0xb62   : > { %3173 = vmatpush3.bf16.msra.mxu1 %v2102_v5 }
 0xb63   : > { %3174 = vmatprep.subr.bf16.mxu1 %v3648_v55 }
 0xb65   : > { %3153 = vmatpush3.bf16.xpose.msra.mxu0 %v2000_v10  ;;  %v2110_v26 = vpop.permute.xlu1 %2109 }
 0xb66   : > { %3175 = vmatpush3.bf16.msra.mxu1 %v2104_v9  ;;  %3154 = vmatprep.subr.bf16.mxu0 %v3648_v55 }
 0xb67   : > { %3176 = vmatprep.subr.bf16.mxu1 %v3648_v55 }
 0xb6a   : > { %3177 = vmatpush3.bf16.msra.mxu1 %v2106_v18 }
 0xb6b   : > { %3178 = vmatprep.subr.bf16.mxu1 %v3648_v55 }
 0xb6d   : > { %3155 = vmatpush3.bf16.xpose.msra.mxu0 %v2003_v19 }
 0xb6e   : > { %3179 = vmatpush3.bf16.msra.mxu1 %v2108_v21  ;;  %3156 = vmatprep.subr.bf16.mxu0 %v3648_v55 }
 0xb6f   : > { %3180 = vmatprep.subr.bf16.mxu1 %v3648_v55 }
 0xb72   : > { %3181 = vmatpush3.bf16.msra.mxu1 %v2110_v26 }
 0xb73   : > { %3182 = vmatprep.subr.bf16.mxu1 %v3648_v55 }
 0xb75   : > { %3157 = vmatpush3.bf16.xpose.msra.mxu0 %v2006_v13 }
 0xb76   : > { %3158 = vmatprep.subr.bf16.mxu0 %v3648_v55 }
 0xb7d   : > { %3159 = vmatpush3.bf16.xpose.msra.mxu0 %v2009_v36 }
 0xb7e   : > { %3160 = vmatprep.subr.bf16.mxu0 %v3648_v55 }
 0xb85   : > { %3161 = vmatpush3.bf16.xpose.msra.mxu0 %v2012_v50 }
 0xb86   : > { %3162 = vmatprep.subr.bf16.mxu0 %v3648_v55 }
 0xb8d   : > { %3163 = vmatpush3.bf16.xpose.msra.mxu0 %v2015_v22 }
 0xb8e   : > { %3208 = vmatprep.subr.bf16.mxu0 %v3648_v55 }
 0xb94   : > { %3165 = vmatmul.mubr.msk.bf16.vlgmr.msra.gmra.mrb[32].mxu0 %vm856_vm1, %v1973_v62 }
 0xb95   : > { %3224 = vmatprep.mubr.msk.bf16.mxu0 %vm3649_vm0, %v3648_v55 }
 0xc27   : > { %v4580_v14 = vpop.f32.mrb[28].mxu0 }
 0xc28   : > { %v3146_v44 = vpop.f32.mrb[29].mxu0 }
 0xc29   : > { %v4582_v17 = vpop.f32.mrb[30].mxu0 }
 0xc2a   : > { %v1971_v47 = vpack.c.bf16 %v4582_v17, %v4580_v14  ;;  %v3147_v58 = vpop.f32.mrb[31].mxu0 }
 0xc67   : > { %v2051_v11 = vpop.f32.mrb[32].mxu0 }
 0xc68   : > { %v3166_v20 = vpop.f32.mrb[33].mxu0 }
 0xc69   : > { %v2054_v6 = vpop.f32.mrb[34].mxu0 }
 0xc6a   : > { %v2058_v56 = vmax.f32 %v2051_v11, %v2054_v6  ;;  %v3167_v57 = vpop.f32.mrb[35].mxu0 }
 0xc6c   : > { %v2059_v60 = vrot.slane %v2058_v56, 4 }
 0xc6e   : > { %v2060_v27 = vmax.f32 %v2058_v56, %v2059_v60 }
 0xc70   : > { %v2061_v28 = vrot.slane %v2060_v27, 2 }
 0xc72   : > { %v2062_v62 = vmax.f32 %v2060_v27, %v2061_v28 }
 0xc74   : > { %v2063_v63 = vrot.slane %v2062_v62, 1 }
 0xc76   : > { %v2064_v38 = vmax.f32 %v2062_v62, %v2063_v63 }
 0xc78   : > { %vm2065_vm8 = vcmp.eq.f32.partialorder %v2051_v11, %v2064_v38  ;;  %vm2066_vm9 = vcmp.eq.f32.partialorder %v2054_v6, %v2064_v38 }
 0xc79   : > { %v2067_v40 = vsel %vm2065_vm8, %v4182_v0, 16  ;;  %v2068_v1 = vsel %vm2066_vm9, %v4185_v15, 16  ;;  %vm1608_vm9 = vcmask 523264  }
 0xc7a   : > { %vm2069_vm10 = vcmp.lt.s32.totalorder %v2067_v40, %v2068_v1 }
 0xc7b   : > { %v2070_v5 = vsel %vm2069_vm10, %v2067_v40, %v2068_v1  ;;  %vm1611_vm10 = vcmask 785408  }
 0xc7c   : > { %v2071_v9 = vrot.slane %v2070_v5, 4 }
 0xc7e   : > { %vm2072_vm11 = vcmp.lt.s32.totalorder %v2070_v5, %v2071_v9 }
 0xc7f   : > { %v2073_v10 = vsel %vm2072_vm11, %v2070_v5, %v2071_v9 }
 0xc80   : > { %v2074_v18 = vrot.slane %v2073_v10, 2 }
 0xc82   : > { %vm2075_vm12 = vcmp.lt.s32.totalorder %v2073_v10, %v2074_v18 }
 0xc83   : > { %v2076_v19 = vsel %vm2075_vm12, %v2073_v10, %v2074_v18 }
 0xc84   : > { %v2077_v21 = vrot.slane %v2076_v19, 1 }
 0xc86   : > { %vm2078_vm13 = vcmp.lt.s32.totalorder %v2076_v19, %v2077_v21 }
 0xc87   : > { %v2079_v26 = vsel %vm2078_vm13, %v2076_v19, %v2077_v21 }
 0xc88   : > { %vm2081_vm14 = vcmp.eq.s32.totalorder %v4185_v15, %v2079_v26  ;;  %vm2080_vm15 = vcmp.eq.s32.totalorder %v4182_v0, %v2079_v26 }
 0xc89   : > { %v2699_v13 = vsel %vm2081_vm14, 1.0, %v3648_v55  ;;  %v2698_v36 = vsel %vm2080_vm15, 1.0, %v3648_v55 }
 0xc8a   : > { %2088 = vadd.xlane.f32.xlu0 %v2699_v13  ;;  %2086 = vadd.xlane.f32.xlu1 %v2698_v36 }
 0xc9b   : > { %2165 = vrot.lane.b32.xlu1 %v4150_v51, %s3652_s7 }
 0xc9f   : > { %2169 = vrot.lane.b32.xlu1 %v4158_v3, %s3652_s7 }
 0xca0   : > { %2111 = vrot.lane.b32.xlu0 %v4180_v49, %s3651_s13 }
 0xca3   : > { %2173 = vrot.lane.b32.xlu1 %v4166_v23, %s3652_s7 }
 0xca4   : > { %2167 = vrot.lane.b32.xlu0 %v4154_v59, %s3652_s7 }
 0xca7   : > { %2177 = vrot.lane.b32.xlu1 %v4174_v39, %s3652_s7 }
 0xca8   : > { %2171 = vrot.lane.b32.xlu0 %v4162_v12, %s3652_s7 }
 0xcab   : > { %2163 = vrot.lane.b32.xlu1 %v4028_v30, %s3652_s7 }
 0xcac   : > { %2175 = vrot.lane.b32.xlu0 %v4170_v29, %s3652_s7 }
 0xcaf   : > { %2290 = vrot.lane.b32.xlu1 %v4156_v61, %s3652_s7 }
 0xcb0   : > { %2179 = vrot.lane.b32.xlu0 %v4178_v46, %s3652_s7 }
 0xcb3   : > { %2294 = vrot.lane.b32.xlu1 %v4164_v16, %s3652_s7 }
 0xcb4   : > { %2288 = vrot.lane.b32.xlu0 %v4152_v52, %s3652_s7 }
 0xcb7   : > { %2298 = vrot.lane.b32.xlu1 %v4172_v32, %s3652_s7 }
 0xcb8   : > { %2292 = vrot.lane.b32.xlu0 %v4160_v8, %s3652_s7 }
 0xcbc   : > { %2296 = vrot.lane.b32.xlu0 %v4168_v25, %s3652_s7 }
 0xd17   : > { %v2089_v30 = vpop.xlane.xlu0 %2088  ;;  %v2087_v51 = vpop.xlane.xlu1 %2086 }
 0xd18   : > { %v2091_v59 = vadd.f32 1.0, %v2089_v30  ;;  %v2090_v61 = vadd.f32 1.0, %v2087_v51 }
 0xd1a   : > { %3406 = vrcp.f32 %v2091_v59 }
 0xd1b   : > { %3408 = vrcp.f32 %v2090_v61  ;;  %v2112_v3 = vpop.permute.xlu0 %2111  ;;  %v2166_v12 = vpop.permute.xlu1 %2165 }
 0xd1c   : > { %3183 = vmatpush3.bf16.msra.mxu1 %v2112_v3  ;;  %v2185_v44 = vsel %vm856_vm1, %v2166_v12, 0 }
 0xd1d   : > { %3188 = vmatprep.subr.bf16.mxu1 %v3648_v55 }
 0xd1f   : > { %v2168_v52 = vpop.permute.xlu0 %2167  ;;  %v2170_v16 = vpop.permute.xlu1 %2169 }
 0xd20   : > { %v2188_v6 = vsel %vm856_vm1, %v2168_v52, 0  ;;  %v2191_v60 = vsel %vm856_vm1, %v2170_v16, 0 }
 0xd23   : > { %v2172_v23 = vpop.permute.xlu0 %2171  ;;  %v2174_v29 = vpop.permute.xlu1 %2173 }
 0xd24   : > { %v3407_v32 = vpop.eup %3406  ;;  %v2194_v62 = vsel %vm856_vm1, %v2172_v23, 0  ;;  %v2197_v38 = vsel %vm856_vm1, %v2174_v29, 0 }
 0xd25   : > { %v3409_v8 = vpop.eup %3408  ;;  %v2095_v39 = vmul.f32 %v3407_v32, %v2699_v13 }
 0xd26   : > { %v2094_v46 = vmul.f32 %v3409_v8, %v2698_v36 }
 0xd27   : > { %v2176_v25 = vpop.permute.xlu0 %2175  ;;  %v2178_v50 = vpop.permute.xlu1 %2177 }
 0xd28   : > { %v2096_v22 = vpack.c.bf16 %v2095_v39, %v2094_v46  ;;  %v2200_v40 = vsel %vm856_vm1, %v2176_v25, 0  ;;  %v2203_v1 = vsel %vm856_vm1, %v2178_v50, 0 }
 0xd2a   : > { %3185 = vmatmul.mubr.bf16.vlgmr.msra.gmra.mrb[84].mxu1 %v2096_v22 }
 0xd2b   : > { %3189 = vmatpush3.bf16.xpose.msra.mxu1 %v2185_v44  ;;  %v2180_v58 = vpop.permute.xlu0 %2179  ;;  %3204 = vmatprep.mubr.msk.bf16.mxu1 %vm3649_vm0, %v3648_v55  ;;  %v2164_v11 = vpop.permute.xlu1 %2163 }
 0xd2c   : > { %3190 = vmatprep.subr.bf16.mxu1 %v3648_v55  ;;  %v2206_v5 = vsel %vm856_vm1, %v2180_v58, 0 }
 0xd2f   : > { %v2289_v20 = vpop.permute.xlu0 %2288  ;;  %v2291_v56 = vpop.permute.xlu1 %2290 }
 0xd30   : > { %3209 = vmatpush3.bf16.msra.mxu0 %v2289_v20 }
 0xd31   : > { %3210 = vmatprep.subr.bf16.mxu0 %v3648_v55 }
 0xd33   : > { %3191 = vmatpush3.bf16.xpose.msra.mxu1 %v2188_v6  ;;  %v2293_v57 = vpop.permute.xlu0 %2292  ;;  %v2295_v27 = vpop.permute.xlu1 %2294 }
 0xd34   : > { %3211 = vmatpush3.bf16.msra.mxu0 %v2291_v56  ;;  %3192 = vmatprep.subr.bf16.mxu1 %v3648_v55 }
 0xd35   : > { %3212 = vmatprep.subr.bf16.mxu0 %v3648_v55 }
 0xd37   : > { %v2297_v28 = vpop.permute.xlu0 %2296  ;;  %v2299_v63 = vpop.permute.xlu1 %2298 }
 0xd38   : > { %3213 = vmatpush3.bf16.msra.mxu0 %v2293_v57  ;;  %v3380_v57 = vld [vmem:[#allocation10 + $0x30] sm:$0xff]  }
 0xd39   : > { %3214 = vmatprep.subr.bf16.mxu0 %v3648_v55 }
 0xd3b   : > { %3193 = vmatpush3.bf16.xpose.msra.mxu1 %v2191_v60  ;;  %v3381_v60 = vld [vmem:[#allocation10 + $0x38] sm:$0xff]  }
 0xd3c   : > { %3215 = vmatpush3.bf16.msra.mxu0 %v2295_v27  ;;  %3194 = vmatprep.subr.bf16.mxu1 %v3648_v55 }
 0xd3d   : > { %3216 = vmatprep.subr.bf16.mxu0 %v3648_v55 }
 0xd40   : > { %3217 = vmatpush3.bf16.msra.mxu0 %v2297_v28 }
 0xd41   : > { %3218 = vmatprep.subr.bf16.mxu0 %v3648_v55 }
 0xd43   : > { %3195 = vmatpush3.bf16.xpose.msra.mxu1 %v2194_v62 }
 0xd44   : > { %3219 = vmatpush3.bf16.msra.mxu0 %v2299_v63  ;;  %3196 = vmatprep.subr.bf16.mxu1 %v3648_v55 }
 0xd45   : > { %3220 = vmatprep.subr.bf16.mxu0 %v3648_v55 }
 0xd4b   : > { %3197 = vmatpush3.bf16.xpose.msra.mxu1 %v2197_v38 }
 0xd4c   : > { %3198 = vmatprep.subr.bf16.mxu1 %v3648_v55 }
 0xd53   : > { %3199 = vmatpush3.bf16.xpose.msra.mxu1 %v2200_v40 }
 0xd54   : > { %3200 = vmatprep.subr.bf16.mxu1 %v3648_v55 }
 0xd5b   : > { %3201 = vmatpush3.bf16.xpose.msra.mxu1 %v2203_v1 }
 0xd5c   : > { %3202 = vmatprep.subr.bf16.mxu1 %v3648_v55 }
 0xd63   : > { %3203 = vmatpush3.bf16.xpose.msra.mxu1 %v2206_v5  ;;  %v2703_v5 = vld [vmem:[%s4748_s5] ss:$0 sm:$0xff] }
 0xd6a   : > { %3205 = vmatmul.mubr.msk.bf16.vlgmr.msra.gmra.mrb[88].mxu1 %vm856_vm1, %v2164_v11 }
 0xdfd   : > { %v2155_v9 = vpop.f32.mrb[84].mxu1 }
 0xdfe   : > { %v3186_v10 = vpop.f32.mrb[85].mxu1 }
 0xdff   : > { %v2158_v18 = vpop.f32.mrb[86].mxu1 }
 0xe00   : > { %v2162_v19 = vpack.c.bf16 %v2158_v18, %v2155_v9  ;;  %v3187_v21 = vpop.f32.mrb[87].mxu1 }
 0xe3d   : > { %v2242_v26 = vpop.f32.mrb[88].mxu1 }
 0xe3e   : > { %v3206_v13 = vpop.f32.mrb[89].mxu1 }
 0xe3f   : > { %v2245_v36 = vpop.f32.mrb[90].mxu1 }
 0xe40   : > { %v2249_v30 = vmax.f32 %v2242_v26, %v2245_v36  ;;  %v3207_v51 = vpop.f32.mrb[91].mxu1 }
 0xe42   : > { %v2250_v59 = vrot.slane %v2249_v30, 4 }
 0xe44   : > { %v2251_v61 = vmax.f32 %v2249_v30, %v2250_v59 }
 0xe46   : > { %v2252_v3 = vrot.slane %v2251_v61, 2 }
 0xe48   : > { %v2253_v12 = vmax.f32 %v2251_v61, %v2252_v3 }
 0xe4a   : > { %v2254_v52 = vrot.slane %v2253_v12, 1 }
 0xe4c   : > { %v2255_v16 = vmax.f32 %v2253_v12, %v2254_v52 }
 0xe4e   : > { %vm2256_vm0 = vcmp.eq.f32.partialorder %v2242_v26, %v2255_v16  ;;  %vm2257_vm2 = vcmp.eq.f32.partialorder %v2245_v36, %v2255_v16 }
 0xe4f   : > { %v2258_v23 = vsel %vm2256_vm0, %v4182_v0, 16  ;;  %v2259_v29 = vsel %vm2257_vm2, %v4185_v15, 16 }
 0xe50   : > { %vm2260_vm3 = vcmp.lt.s32.totalorder %v2258_v23, %v2259_v29 }
 0xe51   : > { %v2261_v32 = vsel %vm2260_vm3, %v2258_v23, %v2259_v29 }
 0xe52   : > { %v2262_v8 = vrot.slane %v2261_v32, 4 }
 0xe54   : > { %vm2263_vm4 = vcmp.lt.s32.totalorder %v2261_v32, %v2262_v8 }
 0xe55   : > { %v2264_v39 = vsel %vm2263_vm4, %v2261_v32, %v2262_v8 }
 0xe56   : > { %v2265_v46 = vrot.slane %v2264_v39, 2 }
 0xe58   : > { %vm2266_vm5 = vcmp.lt.s32.totalorder %v2264_v39, %v2265_v46 }
 0xe59   : > { %v2267_v25 = vsel %vm2266_vm5, %v2264_v39, %v2265_v46 }
 0xe5a   : > { %v2268_v50 = vrot.slane %v2267_v25, 1 }
 0xe5c   : > { %vm2269_vm6 = vcmp.lt.s32.totalorder %v2267_v25, %v2268_v50 }
 0xe5d   : > { %v2270_v22 = vsel %vm2269_vm6, %v2267_v25, %v2268_v50 }
 0xe5e   : > { %vm2272_vm7 = vcmp.eq.s32.totalorder %v4185_v15, %v2270_v22  ;;  %vm2271_vm8 = vcmp.eq.s32.totalorder %v4182_v0, %v2270_v22 }
 0xe5f   : > { %v2702_v44 = vsel %vm2272_vm7, 1.0, %v3648_v55  ;;  %v2701_v58 = vsel %vm2271_vm8, 1.0, %v3648_v55 }
 0xe60   : > { %2279 = vadd.xlane.f32.xlu1 %v2702_v44  ;;  %2277 = vadd.xlane.f32.xlu0 %v2701_v58 }
 0xe71   : > { %2302 = vrot.lane.b32.xlu1 %v4180_v49, %s3652_s7 }
 0xe75   : > { %1600 = vrot.lane.b32.xlu1 %v1404_v4, %s3651_s13 }
 0xe76   : > { %2300 = vrot.lane.b32.xlu0 %v4176_v41, %s3652_s7 }
 0xe79   : > { %1603 = vrot.lane.b32.xlu1 %v1595_v37, %s3650_s27 }
 0xe7a   : > { %1597 = vrot.lane.b32.xlu0 %v1213_v48, %s3652_s7 }
 0xe7e   : > { %2355 = vrot.lane.b32.xlu0 %v1971_v47, %s3652_s7 }
 0xe82   : > { %2358 = vrot.lane.b32.xlu0 %v2162_v19, %s3651_s13 }
 0xeed   : > { %v2278_v49 = vpop.xlane.xlu0 %2277  ;;  %v2280_v0 = vpop.xlane.xlu1 %2279 }
 0xeee   : > { %v2281_v41 = vadd.f32 1.0, %v2278_v49  ;;  %v2282_v15 = vadd.f32 1.0, %v2280_v0 }
 0xef0   : > { %3410 = vrcp.f32 %v2281_v41 }
 0xef1   : > { %3412 = vrcp.f32 %v2282_v15  ;;  %v2301_v43 = vpop.permute.xlu0 %2300  ;;  %v2303_v53 = vpop.permute.xlu1 %2302 }
 0xef2   : > { %3221 = vmatpush3.bf16.msra.mxu0 %v2301_v43 }
 0xef3   : > { %3222 = vmatprep.subr.bf16.mxu0 %v3648_v55 }
 0xef5   : > { %v1598_v42 = vpop.permute.xlu0 %1597  ;;  %v1601_v45 = vpop.permute.xlu1 %1600 }
 0xef6   : > { %3223 = vmatpush3.bf16.msra.mxu0 %v2303_v53  ;;  %v1607_v37 = vsel %vm856_vm1, %v1005_v34, %v1598_v42  ;;  %v3376_v34 = vld [vmem:[#allocation10 + $0x10] sm:$0xff]  }
 0xef7   : > { %v1610_v6 = vsel %vm1608_vm9, %v1607_v37, %v1601_v45  ;;  %3228 = vmatprep.subr.bf16.mxu0 %v3374_v24 }
 0xef9   : > { %v2356_v48 = vpop.permute.xlu0 %2355  ;;  %v1604_v55 = vpop.permute.xlu1 %1603 }
 0xefa   : > { %v3411_v4 = vpop.eup %3410  ;;  %v2365_v17 = vsel %vm856_vm1, %v1763_v35, %v2356_v48  ;;  %v1613_v56 = vsel %vm1611_vm10, %v1610_v6, %v1604_v55  ;;  %v3379_v35 = vld [vmem:[#allocation10 + $0x28] sm:$0xff]  }
 0xefb   : > { %v3413_v54 = vpop.eup %3412  ;;  %v2285_v2 = vmul.f32 %v3411_v4, %v2701_v58 }
 0xefc   : > { %v2286_v14 = vmul.f32 %v3413_v54, %v2702_v44 }
 0xefd   : > { %v2359_v47 = vpop.permute.xlu0 %2358 }
 0xefe   : > { %v2367_v11 = vsel %vm1608_vm9, %v2365_v17, %v2359_v47  ;;  %v2287_v20 = vpack.c.bf16 %v2286_v14, %v2285_v2 }
 0xf00   : > { %3225 = vmatmul.mubr.bf16.vlgmr.msra.gmra.mrb[36].mxu0 %v2287_v20 }
 0xf01   : > { %3244 = vmatprep.mubr.bf16.mxu0 %v1613_v56  ;;  %3229 = vmatpush3.bf16.msra.mxu0 %v3374_v24 }
 0xf02   : > { %3230 = vmatprep.subr.bf16.mxu0 %v3375_v31 }
 0xf05   : > { %3231 = vmatpush3.bf16.msra.mxu0 %v3375_v31 }
 0xf06   : > { %3232 = vmatprep.subr.bf16.mxu0 %v3376_v34 }
 0xf09   : > { %3233 = vmatpush3.bf16.msra.mxu0 %v3376_v34 }
 0xf0a   : > { %3234 = vmatprep.subr.bf16.mxu0 %v3377_v7 }
 0xf0d   : > { %3235 = vmatpush3.bf16.msra.mxu0 %v3377_v7 }
 0xf0e   : > { %3236 = vmatprep.subr.bf16.mxu0 %v3378_v33 }
 0xf11   : > { %3237 = vmatpush3.bf16.msra.mxu0 %v3378_v33 }
 0xf12   : > { %3238 = vmatprep.subr.bf16.mxu0 %v3379_v35 }
 0xf15   : > { %3239 = vmatpush3.bf16.msra.mxu0 %v3379_v35 }
 0xf16   : > { %3240 = vmatprep.subr.bf16.mxu0 %v3380_v57 }
 0xf19   : > { %3241 = vmatpush3.bf16.msra.mxu0 %v3380_v57 }
 0xf1a   : > { %3242 = vmatprep.subr.bf16.mxu0 %v3381_v60 }
 0xf1d   : > { %3243 = vmatpush3.bf16.msra.mxu0 %v3381_v60 }
 0xfd3   : > { %v2346_v27 = vpop.f32.mrb[36].mxu0 }
 0xfd4   : > { %v3226_v28 = vpop.f32.mrb[37].mxu0 }
 0xfd5   : > { %v2349_v62 = vpop.f32.mrb[38].mxu0 }
 0xfd6   : > { %v2353_v63 = vpack.c.bf16 %v2349_v62, %v2346_v27  ;;  %v3227_v38 = vpop.f32.mrb[39].mxu0 }
 0xfd8   : > { %2361 = vrot.lane.b32.xlu1 %v2353_v63, %s3650_s27 }
0x104a   : > { %v2362_v40 = vpop.permute.xlu1 %2361 }
0x104b   : > { %v2369_v1 = vsel %vm1611_vm10, %v2367_v11, %v2362_v40 }
0x104c   : > { %3245 = vmatmul.mubr.bf16.vlgmr.msra.gmra.mrb[40].mxu0 %v2369_v1 }
0x111f   : > { %v3246_v9 = vpop.f32.mrb[40].mxu0 }
0x1120   : > { %v2485_v10 = vadd.f32 %v3246_v9, %v2703_v5  ;;  %v2476_v18 = vpop.f32.mrb[41].mxu0 }
0x1121   : > { %v2477_v19 = vadd.f32 %v2703_v5, %v2476_v18  ;;  %v3247_v21 = vpop.f32.mrb[42].mxu0 }
0x1122   : > { %2493 = vst [vmem:[%s354_s16 + $0x10] sm:$0xff] %v2485_v10  ;;  %v2488_v26 = vadd.f32 %v3247_v21, %v2703_v5  ;;  %v2479_v13 = vpop.f32.mrb[43].mxu0 }
0x1123   : > { %2491 = vst [vmem:[%s354_s16] sm:$0xff] %v2477_v19  ;;  %v2480_v36 = vadd.f32 %v2703_v5, %v2479_v13 }
0x1124   : > { %2494 = vst [vmem:[%s354_s16 + $0x18] sm:$0xff] %v2488_v26 }
0x1125   : > { %2492 = vst [vmem:[%s354_s16 + $0x8] sm:$0xff] %v2480_v36 }
0x1126   : > { %3571 = shalt.err (!%p3568_p3)
}
0x1127   : > { %s3572_s29 = scalar_lea.hbm %s4699_s20, 512  ;;  %s3576_s27 = scalar_lea.hbm %s4749_s6, 1024 }
0x1128   : > { %p3573_p9 = scmp.ne.s32.totalorder %s4699_s20, %s3572_s29  ;;  %p3577_p7 = scmp.lt.u32.totalorder %s4699_s20, %s4749_s6 }
0x1129   : > { %p3578_p12 = scmp.lt.u32.totalorder %s3576_s27, %s3572_s29  ;;  %p3580_p2 = scmp.lt.u32.totalorder %s3572_s29, %s4699_s20 }
0x112a   : > { %p3574_p13 = pnand %p3573_p9, %p3842_p5 }
0x112b   : > { %p3579_p1 = por %p3578_p12, %p3577_p7 }
0x112c   : > { %p3575_p11 = pneg %p3574_p13 }
0x112d   : > { %p3581_p4 = por %p3580_p2, %p3579_p1 }
0x112f   : > { %p3582_p0 = pnand %p3581_p4, %p3575_p11 }
0x1131   : > { %3585 = shalt.err (!%p3582_p0)
}
0x1132   : > { %s3654_s10 = smov 128   ;;  %s3655_s9 = smov 8  }
0x1133   : > { %3264 = dma.vmem_to_hbm [thread:$0]  (%p3842_p5), %s4694_s18, 512, %s4699_s20, %s2496_s25, %s3654_s10, %s3654_s10, %s3655_s9  }
0x1134 PF: > { %s2525_s16 = sand.u32 1, %s3624_s21   ;;  %p4780_p8 = scmp.ne.s32.totalorder %s4760_s28, 0 }
0x1135   : > { %p4781_p6 = scmp.ge.s32.totalorder %s3636_s24, 2  ;;  %s2526_s0 = scalar_lea.sflag [#allocation4], %s2525_s16 }
0x1137   : > { %p3284_p10 = pnand %p4781_p6, %p4780_p8 }
0x1139   : > { %3619 = dma.done.wait (!%p3284_p10), %s2526_s0, 512  }
0x113a   : > { %3621 = vsyncadd (!%p3284_p10), %s2526_s0, 4294966784  ;;  %p23_p3 = scmp.ge.s32.totalorder %s3807_s14, 4   ;;  %s4782_s21 = smov %s3628_s22 }
0x113b   : > { %s4783_s22 = smov %s3632_s23  ;;  %s4784_s23 = smov %s3838_s11 }
0x113c   : > { %s4785_s24 = smov %s3807_s14  ;;  %25 = sbr.rel (!%p23_p3) target bundleno = 13 (0xd), region = 114 }
0x1143   :  { %2531 = vsyncpa [#allocation3], 1 }
0x1144   :  { %2533 = vsyncpa [#allocation3 + $0x1], 1 }
0x1145   :  { %2534 = vsyncpa [#allocation6], 1 }
0x1146   :  { %2536 = vsyncpa [#allocation6 + $0x1], 1 }
0x1147   :  { %2537 = vsyncpa [#allocation9], 1 }
0x1148   :  { %2538 = vsyncpa [#allocation4], 1 }
0x1149   :  { %2540 = vsyncpa [#allocation4 + $0x1], 1 }

</bundles_post_ra>
